<compile_context>
chip_gen: v5e
topology: v5e:2x2
jax: 0.10.0
libtpu: 0.0.40
codegen_flags: <defaults>
</compile_context>

<pallas_src>
import functools

import jax
import jax.numpy as jnp
from jax import lax
from jax.experimental import pallas as pl
from jax.experimental.pallas import tpu as pltpu


def adamnet_lstm_kernel(ids_ref, lens_ref,
                        tproj_ref, b1_ref,
                        whh1_ref, wih2_ref, whh2_ref, b2_ref,
                        wfc_ref, bfc_ref,
                        out_ref):
    """Embedding-gather + 2-layer LSTM time loop + final FC, single invocation.

    ids_ref  : (S, Bp)   int32 token ids (padded batch rows hold id 0)
    lens_ref : (Bp, 1)   int32 sequence lengths (padded rows hold 0 -> frozen)
    tproj    : (Vp, 4H)  f32 pre-projected embedding table (emb_table @ W_ih1)
    b1       : (1, 4H)   f32 layer-1 bias (b_ih + b_hh)
    whh1     : (H, 4H)   bf16 layer-1 hidden->gates (PyTorch gate order i, f, g, o)
    wih2     : (H, 4H)   bf16 layer-2 input->gates
    whh2     : (H, 4H)   bf16 layer-2 hidden->gates
    b2       : (1, 4H)   f32 layer-2 bias (b_ih + b_hh)
    wfc      : (H, Op), bfc : (1, Op)  f32 final linear (output lanes zero-padded)
    out_ref  : (Bp, Op)  f32
    """
    S, B = ids_ref.shape
    Vp = tproj_ref.shape[0]
    H = whh1_ref.shape[0]
    G = 4 * H

    # ---- Fused embedding gather + layer-1 input projection, off the recurrent
    # chain: one-hot(ids) @ tproj is an exact row-select done on the MXU.
    ids = ids_ref[...]                                                 # (S, B)
    onehot = (ids[:, :, None] ==
              lax.broadcasted_iota(jnp.int32, (S, B, Vp), 2)).astype(jnp.float32)
    xproj = (jnp.dot(onehot.reshape(S * B, Vp), tproj_ref[...],
                     preferred_element_type=jnp.float32)
             + b1_ref[...])                                            # (S*B, 4H)

    # ---- All S packed-sequence masks built once (no per-step mask derivation).
    lens = lens_ref[...]                                               # (B, 1)
    masks = (lax.broadcasted_iota(jnp.int32, (S, B, H), 0)
             < jnp.broadcast_to(lens[None, :, :], (S, B, H)))          # (S,B,H) bool

    # Loop-invariant weights / broadcasted bias, loaded once.
    whh1 = whh1_ref[...]
    wih2 = wih2_ref[...]
    whh2 = whh2_ref[...]
    b2b = jnp.broadcast_to(b2_ref[...], (B, G))

    def gate_act(gates, c):
        # sigmoid(x) = 0.5*tanh(0.5*x)+0.5 -> a single EUP pass over the full 4H
        # gate vreg (i/f/o sliced from it), plus tanh(g) and tanh(c_new).
        sig = 0.5 * jnp.tanh(0.5 * gates) + 0.5
        i_g = sig[:, 0 * H:1 * H]
        f_g = sig[:, 1 * H:2 * H]
        o_g = sig[:, 3 * H:4 * H]
        g_g = jnp.tanh(gates[:, 2 * H:3 * H])
        c_new = f_g * c + i_g * g_g
        h_new = o_g * jnp.tanh(c_new)
        return h_new, c_new

    h1 = c1 = h2 = c2 = jnp.zeros((B, H), jnp.float32)

    # Fully unrolled static time loop (S is small & static): the scheduler can
    # overlap layer-2 of step t with layer-1 of step t+1, and xproj / mask slices
    # are static (no per-step loads).
    for t in range(S):
        xp_t = xproj[t * B:(t + 1) * B]                                # static slice

        # Layer 1: only the K=H bf16 recurrent matmul sits on the serial chain.
        g1 = xp_t + jnp.dot(h1.astype(jnp.bfloat16), whh1,
                            preferred_element_type=jnp.float32)
        h1n, c1 = gate_act(g1, c1)

        # Layer 2: split matmuls (no concat). h2 @ whh2 depends only on the
        # previous step's state, so it can issue at the top of the step and
        # overlap layer-1; adjacent dot+dot+add enables MRB accumulation on v7x.
        g2 = (jnp.dot(h1n.astype(jnp.bfloat16), wih2,
                      preferred_element_type=jnp.float32)
              + jnp.dot(h2.astype(jnp.bfloat16), whh2,
                        preferred_element_type=jnp.float32)
              + b2b)
        h2n, c2 = gate_act(g2, c2)

        # Packed-sequence freeze. The mask is monotone non-increasing in t
        # (t < length[b]), so only the observed h2 needs a select: frozen rows'
        # h1/c1/c2 may keep integrating values that are never read into h2.
        h2 = jnp.where(masks[t], h2n, h2)
        h1 = h1n

    # scores = fc(hidden_state[-1])  (f32, lane-dense output store, O padded to 128)
    out_ref[...] = (jnp.dot(h2, wfc_ref[...], preferred_element_type=jnp.float32)
                    + bfc_ref[...])


def _round_up(x, m):
    return ((x + m - 1) // m) * m


def prepare_params(params):
    """One-time weight prep (OFF the per-call hot path): padding, pre-projection
    of the embedding table through W_ih1, and bf16 casts of the recurrent-chain
    weights."""
    V, E = params["embedding"].shape
    H = params["whh1"].shape[0]
    O = params["wfc"].shape[1]
    Vp = _round_up(max(V, 8), 128)
    Op = _round_up(O, 128)

    # Embedding followed immediately by the layer-1 input projection: pre-project
    # the whole table so the per-call gather+projection is a single one-hot matmul.
    tproj = params["embedding"].astype(jnp.float32) @ params["wih1"]   # (V, 4H)
    tproj = jnp.pad(tproj, ((0, Vp - V), (0, 0)))

    return {
        "tproj": tproj,                                                # (Vp, 4H) f32
        "b1": params["b1"].astype(jnp.float32),
        "whh1": params["whh1"].astype(jnp.bfloat16),
        "wih2": params["wih2"].astype(jnp.bfloat16),
        "whh2": params["whh2"].astype(jnp.bfloat16),
        "b2": params["b2"].astype(jnp.float32),
        "wfc": jnp.pad(params["wfc"], ((0, 0), (0, Op - O))).astype(jnp.float32),
        "bfc": jnp.pad(params["bfc"], ((0, 0), (0, Op - O))).astype(jnp.float32),
    }


@functools.partial(jax.jit, static_argnames=("output_dim",))
def adamnet_v2_forward(input_sequence, sequence_length, prepared, *, output_dim):
    """input_sequence: (S, B) int32 token ids; sequence_length: (B,) int32 lengths;
    prepared: output of prepare_params()."""
    S, B = input_sequence.shape
    Vp = prepared["tproj"].shape[0]
    Op = prepared["wfc"].shape[1]
    Bp = _round_up(max(B, 8), 8)       # sublane-aligned batch

    # The only per-call glue: two tiny integer pads (fused under this jit).
    ids = jnp.pad(input_sequence.astype(jnp.int32), ((0, 0), (0, Bp - B)))   # (S,Bp)
    lens = jnp.pad(sequence_length.astype(jnp.int32), (0, Bp - B))[:, None]  # (Bp,1)

    out = pl.pallas_call(
        adamnet_lstm_kernel,
        out_shape=jax.ShapeDtypeStruct((Bp, Op), jnp.float32),
        # No grid: single invocation, every operand VMEM-resident (tiny shapes).
        in_specs=[pl.BlockSpec(memory_space=pltpu.MemorySpace.VMEM)] * 10,
        out_specs=pl.BlockSpec(memory_space=pltpu.MemorySpace.VMEM),
    )(ids, lens,
      prepared["tproj"], prepared["b1"],
      prepared["whh1"], prepared["wih2"], prepared["whh2"], prepared["b2"],
      prepared["wfc"], prepared["bfc"])
    return out[:B, :output_dim]


def adamnet_v2_reference(input_sequence, sequence_length, params):
    """Pure-JAX reference (all-float32) mirroring the PyTorch eval forward."""
    S, B = input_sequence.shape
    H = params["whh1"].shape[0]
    emb = jnp.take(params["embedding"], input_sequence, axis=0).astype(jnp.float32)

    def cell(x, h, c, wih, whh, b):
        gates = x @ wih + h @ whh + b
        i = jax.nn.sigmoid(gates[:, 0 * H:1 * H])
        f = jax.nn.sigmoid(gates[:, 1 * H:2 * H])
        g = jnp.tanh(gates[:, 2 * H:3 * H])
        o = jax.nn.sigmoid(gates[:, 3 * H:4 * H])
        c = f * c + i * g
        return o * jnp.tanh(c), c

    h1 = c1 = h2 = c2 = jnp.zeros((B, H), jnp.float32)
    for t in range(S):
        m = (t < sequence_length)[:, None].astype(jnp.float32)
        h1n, c1n = cell(emb[t], h1, c1, params["wih1"], params["whh1"], params["b1"])
        h2n, c2n = cell(h1n, h2, c2, params["wih2"], params["whh2"], params["b2"])
        h1 = m * h1n + (1 - m) * h1
        c1 = m * c1n + (1 - m) * c1
        h2 = m * h2n + (1 - m) * h2
        c2 = m * c2n + (1 - m) * c2
    return h2 @ params["wfc"] + params["bfc"]


def init_params(key, vocab_size, embedding_dim, hidden_dim, output_dim):
    ks = jax.random.split(key, 12)
    H = hidden_dim
    scale = 1.0 / jnp.sqrt(jnp.float32(H))

    def u(k, shape):
        return jax.random.uniform(k, shape, jnp.float32, -scale, scale)

    params = {
        "embedding": jax.random.normal(ks[0], (vocab_size, embedding_dim), jnp.float32),
        # weights stored pre-transposed: (in_dim, 4H) so the kernel computes x @ W
        "wih1": u(ks[1], (embedding_dim, 4 * H)),
        "whh1": u(ks[2], (H, 4 * H)),
        "b1":   u(ks[3], (1, 4 * H)) + u(ks[4], (1, 4 * H)),   # b_ih + b_hh
        "wih2": u(ks[5], (H, 4 * H)),
        "whh2": u(ks[6], (H, 4 * H)),
        "b2":   u(ks[7], (1, 4 * H)) + u(ks[8], (1, 4 * H)),
        "wfc":  u(ks[9], (H, output_dim)),
        "bfc":  u(ks[10], (1, output_dim)),
    }
    return params


if __name__ == "__main__":
    vocab_size = 50
    embedding_dim = 100
    hidden_dim = 32
    output_dim = 1
    seq_len = 8
    batch = 2

    key = jax.random.PRNGKey(0)
    k_tok, k_param = jax.random.split(key)

    # (seq_len, batch) token ids; lengths sorted descending (pack_padded_sequence default)
    input_sequence = jax.random.randint(k_tok, (seq_len, batch), 0, vocab_size, jnp.int32)
    sequence_length = jnp.array([8, 5], dtype=jnp.int32)

    params = init_params(k_param, vocab_size, embedding_dim, hidden_dim, output_dim)
    prepared = prepare_params(params)   # one-time; off the per-call hot path

    scores = adamnet_v2_forward(input_sequence, sequence_length, prepared,
                                output_dim=output_dim)
    scores = jax.block_until_ready(scores)
    assert scores.shape == (batch, output_dim)

    ref = jax.block_until_ready(
        adamnet_v2_reference(input_sequence, sequence_length, params))
    # Recurrent-chain matmuls use bf16 operands (f32 accumulation); tolerance vs the
    # all-f32 reference is relaxed accordingly (observed error is a few 1e-3).
    assert jnp.allclose(scores, ref, atol=3e-2, rtol=1e-2), (scores, ref)

    print("KERNEL_OK")
</pallas_src>

<mosaic_0001>
module attributes {stable_mosaic.version = 11 : i64} {
  func.func @adamnet_lstm_kernel(%arg0: memref<8x8xi32, #tpu.memory_space<vmem>>, %arg1: memref<8x1xi32, #tpu.memory_space<vmem>>, %arg2: memref<128x128xf32, #tpu.memory_space<vmem>>, %arg3: memref<1x128xf32, #tpu.memory_space<vmem>>, %arg4: memref<32x128xbf16, #tpu.memory_space<vmem>>, %arg5: memref<32x128xbf16, #tpu.memory_space<vmem>>, %arg6: memref<32x128xbf16, #tpu.memory_space<vmem>>, %arg7: memref<1x128xf32, #tpu.memory_space<vmem>>, %arg8: memref<32x128xf32, #tpu.memory_space<vmem>>, %arg9: memref<1x128xf32, #tpu.memory_space<vmem>>, %arg10: memref<8x128xf32, #tpu.memory_space<vmem>>) attributes {dimension_semantics = [], scalar_prefetch = 0 : i64, scratch_operands = 0 : i64, tpu.core_type = #tpu.core_type<tc>} {
    %c0 = arith.constant 0 : index
    %c0_0 = arith.constant 0 : index
    %0 = vector.load %arg0[%c0, %c0_0] : memref<8x8xi32, #tpu.memory_space<vmem>>, vector<8x8xi32>
    %1 = vector.shape_cast %0 : vector<8x8xi32> to vector<8x8x1xi32>
    %2 = tpu.iota {dimensions = array<i32: 2>} : vector<8x8x128xi32>
    %3 = vector.broadcast %1 : vector<8x8x1xi32> to vector<8x8x128xi32>
    %4 = arith.cmpi eq, %3, %2 : vector<8x8x128xi32>
    %5 = arith.extui %4 : vector<8x8x128xi1> to vector<8x8x128xi32>
    %6 = arith.sitofp %5 : vector<8x8x128xi32> to vector<8x8x128xf32>
    %7 = vector.shape_cast %6 : vector<8x8x128xf32> to vector<64x128xf32>
    %c0_1 = arith.constant 0 : index
    %c0_2 = arith.constant 0 : index
    %8 = vector.load %arg2[%c0_1, %c0_2] : memref<128x128xf32, #tpu.memory_space<vmem>>, vector<128x128xf32>
    %cst = arith.constant dense<0.000000e+00> : vector<64x128xf32>
    %9 = tpu.matmul %7, %8, %cst {dimension_numbers = #tpu.dot_dimension_numbers<[1], [0], [0], [1], [0, 0, 1, 1], [], []>} : vector<64x128xf32>, vector<128x128xf32>, vector<64x128xf32> -> vector<64x128xf32>
    %c0_3 = arith.constant 0 : index
    %c0_4 = arith.constant 0 : index
    %10 = vector.load %arg3[%c0_3, %c0_4] : memref<1x128xf32, #tpu.memory_space<vmem>>, vector<1x128xf32>
    %11 = vector.broadcast %10 : vector<1x128xf32> to vector<64x128xf32>
    %12 = arith.addf %9, %11 : vector<64x128xf32>
    %c0_5 = arith.constant 0 : index
    %c0_6 = arith.constant 0 : index
    %13 = vector.load %arg1[%c0_5, %c0_6] : memref<8x1xi32, #tpu.memory_space<vmem>>, vector<8x1xi32>
    %14 = tpu.iota {dimensions = array<i32: 0>} : vector<8x8x32xi32>
    %15 = vector.shape_cast %13 : vector<8x1xi32> to vector<1x8x1xi32>
    %16 = vector.shape_cast %15 : vector<1x8x1xi32> to vector<1x8x1xi32>
    %17 = vector.broadcast %16 : vector<1x8x1xi32> to vector<8x8x32xi32>
    %18 = arith.cmpi slt, %14, %17 : vector<8x8x32xi32>
    %c0_7 = arith.constant 0 : index
    %c0_8 = arith.constant 0 : index
    %19 = vector.load %arg4[%c0_7, %c0_8] : memref<32x128xbf16, #tpu.memory_space<vmem>>, vector<32x128xbf16>
    %c0_9 = arith.constant 0 : index
    %c0_10 = arith.constant 0 : index
    %20 = vector.load %arg5[%c0_9, %c0_10] : memref<32x128xbf16, #tpu.memory_space<vmem>>, vector<32x128xbf16>
    %c0_11 = arith.constant 0 : index
    %c0_12 = arith.constant 0 : index
    %21 = vector.load %arg6[%c0_11, %c0_12] : memref<32x128xbf16, #tpu.memory_space<vmem>>, vector<32x128xbf16>
    %c0_13 = arith.constant 0 : index
    %c0_14 = arith.constant 0 : index
    %22 = vector.load %arg7[%c0_13, %c0_14] : memref<1x128xf32, #tpu.memory_space<vmem>>, vector<1x128xf32>
    %23 = vector.shape_cast %22 : vector<1x128xf32> to vector<1x128xf32>
    %24 = vector.broadcast %23 : vector<1x128xf32> to vector<8x128xf32>
    %cst_15 = arith.constant 0.000000e+00 : f32
    %25 = vector.broadcast %cst_15 : f32 to vector<8x32xf32>
    %26 = vector.extract_strided_slice %12 {offsets = [0, 0], sizes = [8, 128], strides = [1, 1]} : vector<64x128xf32> to vector<8x128xf32>
    %27 = arith.truncf %25 : vector<8x32xf32> to vector<8x32xbf16>
    %cst_16 = arith.constant dense<0.000000e+00> : vector<8x128xf32>
    %28 = tpu.matmul %27, %19, %cst_16 {dimension_numbers = #tpu.dot_dimension_numbers<[1], [0], [0], [1], [0, 0, 1, 1], [], []>} : vector<8x32xbf16>, vector<32x128xbf16>, vector<8x128xf32> -> vector<8x128xf32>
    %29 = arith.addf %26, %28 : vector<8x128xf32>
    %cst_17 = arith.constant 5.000000e-01 : f32
    %30 = vector.broadcast %cst_17 : f32 to vector<8x128xf32>
    %31 = arith.mulf %30, %29 : vector<8x128xf32>
    %32 = math.tanh %31 : vector<8x128xf32>
    %cst_18 = arith.constant 5.000000e-01 : f32
    %33 = vector.broadcast %cst_18 : f32 to vector<8x128xf32>
    %34 = arith.mulf %33, %32 : vector<8x128xf32>
    %cst_19 = arith.constant 5.000000e-01 : f32
    %35 = vector.broadcast %cst_19 : f32 to vector<8x128xf32>
    %36 = arith.addf %34, %35 : vector<8x128xf32>
    %37 = vector.extract_strided_slice %36 {offsets = [0, 0], sizes = [8, 32], strides = [1, 1]} : vector<8x128xf32> to vector<8x32xf32>
    %38 = vector.extract_strided_slice %36 {offsets = [0, 32], sizes = [8, 32], strides = [1, 1]} : vector<8x128xf32> to vector<8x32xf32>
    %39 = vector.extract_strided_slice %36 {offsets = [0, 96], sizes = [8, 32], strides = [1, 1]} : vector<8x128xf32> to vector<8x32xf32>
    %40 = vector.extract_strided_slice %29 {offsets = [0, 64], sizes = [8, 32], strides = [1, 1]} : vector<8x128xf32> to vector<8x32xf32>
    %41 = math.tanh %40 : vector<8x32xf32>
    %42 = arith.mulf %38, %25 : vector<8x32xf32>
    %43 = arith.mulf %37, %41 : vector<8x32xf32>
    %44 = arith.addf %42, %43 : vector<8x32xf32>
    %45 = math.tanh %44 : vector<8x32xf32>
    %46 = arith.mulf %39, %45 : vector<8x32xf32>
    %47 = arith.truncf %46 : vector<8x32xf32> to vector<8x32xbf16>
    %cst_20 = arith.constant dense<0.000000e+00> : vector<8x128xf32>
    %48 = tpu.matmul %47, %20, %cst_20 {dimension_numbers = #tpu.dot_dimension_numbers<[1], [0], [0], [1], [0, 0, 1, 1], [], []>} : vector<8x32xbf16>, vector<32x128xbf16>, vector<8x128xf32> -> vector<8x128xf32>
    %49 = arith.truncf %25 : vector<8x32xf32> to vector<8x32xbf16>
    %cst_21 = arith.constant dense<0.000000e+00> : vector<8x128xf32>
    %50 = tpu.matmul %49, %21, %cst_21 {dimension_numbers = #tpu.dot_dimension_numbers<[1], [0], [0], [1], [0, 0, 1, 1], [], []>} : vector<8x32xbf16>, vector<32x128xbf16>, vector<8x128xf32> -> vector<8x128xf32>
    %51 = arith.addf %48, %50 : vector<8x128xf32>
    %52 = arith.addf %51, %24 : vector<8x128xf32>
    %cst_22 = arith.constant 5.000000e-01 : f32
    %53 = vector.broadcast %cst_22 : f32 to vector<8x128xf32>
    %54 = arith.mulf %53, %52 : vector<8x128xf32>
    %55 = math.tanh %54 : vector<8x128xf32>
    %cst_23 = arith.constant 5.000000e-01 : f32
    %56 = vector.broadcast %cst_23 : f32 to vector<8x128xf32>
    %57 = arith.mulf %56, %55 : vector<8x128xf32>
    %cst_24 = arith.constant 5.000000e-01 : f32
    %58 = vector.broadcast %cst_24 : f32 to vector<8x128xf32>
    %59 = arith.addf %57, %58 : vector<8x128xf32>
    %60 = vector.extract_strided_slice %59 {offsets = [0, 0], sizes = [8, 32], strides = [1, 1]} : vector<8x128xf32> to vector<8x32xf32>
    %61 = vector.extract_strided_slice %59 {offsets = [0, 32], sizes = [8, 32], strides = [1, 1]} : vector<8x128xf32> to vector<8x32xf32>
    %62 = vector.extract_strided_slice %59 {offsets = [0, 96], sizes = [8, 32], strides = [1, 1]} : vector<8x128xf32> to vector<8x32xf32>
    %63 = vector.extract_strided_slice %52 {offsets = [0, 64], sizes = [8, 32], strides = [1, 1]} : vector<8x128xf32> to vector<8x32xf32>
    %64 = math.tanh %63 : vector<8x32xf32>
    %65 = arith.mulf %61, %25 : vector<8x32xf32>
    %66 = arith.mulf %60, %64 : vector<8x32xf32>
    %67 = arith.addf %65, %66 : vector<8x32xf32>
    %68 = math.tanh %67 : vector<8x32xf32>
    %69 = arith.mulf %62, %68 : vector<8x32xf32>
    %70 = vector.extract_strided_slice %18 {offsets = [0, 0, 0], sizes = [1, 8, 32], strides = [1, 1, 1]} : vector<8x8x32xi1> to vector<1x8x32xi1>
    %71 = vector.shape_cast %70 : vector<1x8x32xi1> to vector<8x32xi1>
    %72 = arith.select %71, %69, %25 : vector<8x32xi1>, vector<8x32xf32>
    %73 = vector.extract_strided_slice %12 {offsets = [8, 0], sizes = [8, 128], strides = [1, 1]} : vector<64x128xf32> to vector<8x128xf32>
    %74 = arith.truncf %46 : vector<8x32xf32> to vector<8x32xbf16>
    %cst_25 = arith.constant dense<0.000000e+00> : vector<8x128xf32>
    %75 = tpu.matmul %74, %19, %cst_25 {dimension_numbers = #tpu.dot_dimension_numbers<[1], [0], [0], [1], [0, 0, 1, 1], [], []>} : vector<8x32xbf16>, vector<32x128xbf16>, vector<8x128xf32> -> vector<8x128xf32>
    %76 = arith.addf %73, %75 : vector<8x128xf32>
    %cst_26 = arith.constant 5.000000e-01 : f32
    %77 = vector.broadcast %cst_26 : f32 to vector<8x128xf32>
    %78 = arith.mulf %77, %76 : vector<8x128xf32>
    %79 = math.tanh %78 : vector<8x128xf32>
    %cst_27 = arith.constant 5.000000e-01 : f32
    %80 = vector.broadcast %cst_27 : f32 to vector<8x128xf32>
    %81 = arith.mulf %80, %79 : vector<8x128xf32>
    %cst_28 = arith.constant 5.000000e-01 : f32
    %82 = vector.broadcast %cst_28 : f32 to vector<8x128xf32>
    %83 = arith.addf %81, %82 : vector<8x128xf32>
    %84 = vector.extract_strided_slice %83 {offsets = [0, 0], sizes = [8, 32], strides = [1, 1]} : vector<8x128xf32> to vector<8x32xf32>
    %85 = vector.extract_strided_slice %83 {offsets = [0, 32], sizes = [8, 32], strides = [1, 1]} : vector<8x128xf32> to vector<8x32xf32>
    %86 = vector.extract_strided_slice %83 {offsets = [0, 96], sizes = [8, 32], strides = [1, 1]} : vector<8x128xf32> to vector<8x32xf32>
    %87 = vector.extract_strided_slice %76 {offsets = [0, 64], sizes = [8, 32], strides = [1, 1]} : vector<8x128xf32> to vector<8x32xf32>
    %88 = math.tanh %87 : vector<8x32xf32>
    %89 = arith.mulf %85, %44 : vector<8x32xf32>
    %90 = arith.mulf %84, %88 : vector<8x32xf32>
    %91 = arith.addf %89, %90 : vector<8x32xf32>
    %92 = math.tanh %91 : vector<8x32xf32>
    %93 = arith.mulf %86, %92 : vector<8x32xf32>
    %94 = arith.truncf %93 : vector<8x32xf32> to vector<8x32xbf16>
    %cst_29 = arith.constant dense<0.000000e+00> : vector<8x128xf32>
    %95 = tpu.matmul %94, %20, %cst_29 {dimension_numbers = #tpu.dot_dimension_numbers<[1], [0], [0], [1], [0, 0, 1, 1], [], []>} : vector<8x32xbf16>, vector<32x128xbf16>, vector<8x128xf32> -> vector<8x128xf32>
    %96 = arith.truncf %72 : vector<8x32xf32> to vector<8x32xbf16>
    %cst_30 = arith.constant dense<0.000000e+00> : vector<8x128xf32>
    %97 = tpu.matmul %96, %21, %cst_30 {dimension_numbers = #tpu.dot_dimension_numbers<[1], [0], [0], [1], [0, 0, 1, 1], [], []>} : vector<8x32xbf16>, vector<32x128xbf16>, vector<8x128xf32> -> vector<8x128xf32>
    %98 = arith.addf %95, %97 : vector<8x128xf32>
    %99 = arith.addf %98, %24 : vector<8x128xf32>
    %cst_31 = arith.constant 5.000000e-01 : f32
    %100 = vector.broadcast %cst_31 : f32 to vector<8x128xf32>
    %101 = arith.mulf %100, %99 : vector<8x128xf32>
    %102 = math.tanh %101 : vector<8x128xf32>
    %cst_32 = arith.constant 5.000000e-01 : f32
    %103 = vector.broadcast %cst_32 : f32 to vector<8x128xf32>
    %104 = arith.mulf %103, %102 : vector<8x128xf32>
    %cst_33 = arith.constant 5.000000e-01 : f32
    %105 = vector.broadcast %cst_33 : f32 to vector<8x128xf32>
    %106 = arith.addf %104, %105 : vector<8x128xf32>
    %107 = vector.extract_strided_slice %106 {offsets = [0, 0], sizes = [8, 32], strides = [1, 1]} : vector<8x128xf32> to vector<8x32xf32>
    %108 = vector.extract_strided_slice %106 {offsets = [0, 32], sizes = [8, 32], strides = [1, 1]} : vector<8x128xf32> to vector<8x32xf32>
    %109 = vector.extract_strided_slice %106 {offsets = [0, 96], sizes = [8, 32], strides = [1, 1]} : vector<8x128xf32> to vector<8x32xf32>
    %110 = vector.extract_strided_slice %99 {offsets = [0, 64], sizes = [8, 32], strides = [1, 1]} : vector<8x128xf32> to vector<8x32xf32>
    %111 = math.tanh %110 : vector<8x32xf32>
    %112 = arith.mulf %108, %67 : vector<8x32xf32>
    %113 = arith.mulf %107, %111 : vector<8x32xf32>
    %114 = arith.addf %112, %113 : vector<8x32xf32>
    %115 = math.tanh %114 : vector<8x32xf32>
    %116 = arith.mulf %109, %115 : vector<8x32xf32>
    %117 = vector.extract_strided_slice %18 {offsets = [1, 0, 0], sizes = [1, 8, 32], strides = [1, 1, 1]} : vector<8x8x32xi1> to vector<1x8x32xi1>
    %118 = vector.shape_cast %117 : vector<1x8x32xi1> to vector<8x32xi1>
    %119 = arith.select %118, %116, %72 : vector<8x32xi1>, vector<8x32xf32>
    %120 = vector.extract_strided_slice %12 {offsets = [16, 0], sizes = [8, 128], strides = [1, 1]} : vector<64x128xf32> to vector<8x128xf32>
    %121 = arith.truncf %93 : vector<8x32xf32> to vector<8x32xbf16>
    %cst_34 = arith.constant dense<0.000000e+00> : vector<8x128xf32>
    %122 = tpu.matmul %121, %19, %cst_34 {dimension_numbers = #tpu.dot_dimension_numbers<[1], [0], [0], [1], [0, 0, 1, 1], [], []>} : vector<8x32xbf16>, vector<32x128xbf16>, vector<8x128xf32> -> vector<8x128xf32>
    %123 = arith.addf %120, %122 : vector<8x128xf32>
    %cst_35 = arith.constant 5.000000e-01 : f32
    %124 = vector.broadcast %cst_35 : f32 to vector<8x128xf32>
    %125 = arith.mulf %124, %123 : vector<8x128xf32>
    %126 = math.tanh %125 : vector<8x128xf32>
    %cst_36 = arith.constant 5.000000e-01 : f32
    %127 = vector.broadcast %cst_36 : f32 to vector<8x128xf32>
    %128 = arith.mulf %127, %126 : vector<8x128xf32>
    %cst_37 = arith.constant 5.000000e-01 : f32
    %129 = vector.broadcast %cst_37 : f32 to vector<8x128xf32>
    %130 = arith.addf %128, %129 : vector<8x128xf32>
    %131 = vector.extract_strided_slice %130 {offsets = [0, 0], sizes = [8, 32], strides = [1, 1]} : vector<8x128xf32> to vector<8x32xf32>
    %132 = vector.extract_strided_slice %130 {offsets = [0, 32], sizes = [8, 32], strides = [1, 1]} : vector<8x128xf32> to vector<8x32xf32>
    %133 = vector.extract_strided_slice %130 {offsets = [0, 96], sizes = [8, 32], strides = [1, 1]} : vector<8x128xf32> to vector<8x32xf32>
    %134 = vector.extract_strided_slice %123 {offsets = [0, 64], sizes = [8, 32], strides = [1, 1]} : vector<8x128xf32> to vector<8x32xf32>
    %135 = math.tanh %134 : vector<8x32xf32>
    %136 = arith.mulf %132, %91 : vector<8x32xf32>
    %137 = arith.mulf %131, %135 : vector<8x32xf32>
    %138 = arith.addf %136, %137 : vector<8x32xf32>
    %139 = math.tanh %138 : vector<8x32xf32>
    %140 = arith.mulf %133, %139 : vector<8x32xf32>
    %141 = arith.truncf %140 : vector<8x32xf32> to vector<8x32xbf16>
    %cst_38 = arith.constant dense<0.000000e+00> : vector<8x128xf32>
    %142 = tpu.matmul %141, %20, %cst_38 {dimension_numbers = #tpu.dot_dimension_numbers<[1], [0], [0], [1], [0, 0, 1, 1], [], []>} : vector<8x32xbf16>, vector<32x128xbf16>, vector<8x128xf32> -> vector<8x128xf32>
    %143 = arith.truncf %119 : vector<8x32xf32> to vector<8x32xbf16>
    %cst_39 = arith.constant dense<0.000000e+00> : vector<8x128xf32>
    %144 = tpu.matmul %143, %21, %cst_39 {dimension_numbers = #tpu.dot_dimension_numbers<[1], [0], [0], [1], [0, 0, 1, 1], [], []>} : vector<8x32xbf16>, vector<32x128xbf16>, vector<8x128xf32> -> vector<8x128xf32>
    %145 = arith.addf %142, %144 : vector<8x128xf32>
    %146 = arith.addf %145, %24 : vector<8x128xf32>
    %cst_40 = arith.constant 5.000000e-01 : f32
    %147 = vector.broadcast %cst_40 : f32 to vector<8x128xf32>
    %148 = arith.mulf %147, %146 : vector<8x128xf32>
    %149 = math.tanh %148 : vector<8x128xf32>
    %cst_41 = arith.constant 5.000000e-01 : f32
    %150 = vector.broadcast %cst_41 : f32 to vector<8x128xf32>
    %151 = arith.mulf %150, %149 : vector<8x128xf32>
    %cst_42 = arith.constant 5.000000e-01 : f32
    %152 = vector.broadcast %cst_42 : f32 to vector<8x128xf32>
    %153 = arith.addf %151, %152 : vector<8x128xf32>
    %154 = vector.extract_strided_slice %153 {offsets = [0, 0], sizes = [8, 32], strides = [1, 1]} : vector<8x128xf32> to vector<8x32xf32>
    %155 = vector.extract_strided_slice %153 {offsets = [0, 32], sizes = [8, 32], strides = [1, 1]} : vector<8x128xf32> to vector<8x32xf32>
    %156 = vector.extract_strided_slice %153 {offsets = [0, 96], sizes = [8, 32], strides = [1, 1]} : vector<8x128xf32> to vector<8x32xf32>
    %157 = vector.extract_strided_slice %146 {offsets = [0, 64], sizes = [8, 32], strides = [1, 1]} : vector<8x128xf32> to vector<8x32xf32>
    %158 = math.tanh %157 : vector<8x32xf32>
    %159 = arith.mulf %155, %114 : vector<8x32xf32>
    %160 = arith.mulf %154, %158 : vector<8x32xf32>
    %161 = arith.addf %159, %160 : vector<8x32xf32>
    %162 = math.tanh %161 : vector<8x32xf32>
    %163 = arith.mulf %156, %162 : vector<8x32xf32>
    %164 = vector.extract_strided_slice %18 {offsets = [2, 0, 0], sizes = [1, 8, 32], strides = [1, 1, 1]} : vector<8x8x32xi1> to vector<1x8x32xi1>
    %165 = vector.shape_cast %164 : vector<1x8x32xi1> to vector<8x32xi1>
    %166 = arith.select %165, %163, %119 : vector<8x32xi1>, vector<8x32xf32>
    %167 = vector.extract_strided_slice %12 {offsets = [24, 0], sizes = [8, 128], strides = [1, 1]} : vector<64x128xf32> to vector<8x128xf32>
    %168 = arith.truncf %140 : vector<8x32xf32> to vector<8x32xbf16>
    %cst_43 = arith.constant dense<0.000000e+00> : vector<8x128xf32>
    %169 = tpu.matmul %168, %19, %cst_43 {dimension_numbers = #tpu.dot_dimension_numbers<[1], [0], [0], [1], [0, 0, 1, 1], [], []>} : vector<8x32xbf16>, vector<32x128xbf16>, vector<8x128xf32> -> vector<8x128xf32>
    %170 = arith.addf %167, %169 : vector<8x128xf32>
    %cst_44 = arith.constant 5.000000e-01 : f32
    %171 = vector.broadcast %cst_44 : f32 to vector<8x128xf32>
    %172 = arith.mulf %171, %170 : vector<8x128xf32>
    %173 = math.tanh %172 : vector<8x128xf32>
    %cst_45 = arith.constant 5.000000e-01 : f32
    %174 = vector.broadcast %cst_45 : f32 to vector<8x128xf32>
    %175 = arith.mulf %174, %173 : vector<8x128xf32>
    %cst_46 = arith.constant 5.000000e-01 : f32
    %176 = vector.broadcast %cst_46 : f32 to vector<8x128xf32>
    %177 = arith.addf %175, %176 : vector<8x128xf32>
    %178 = vector.extract_strided_slice %177 {offsets = [0, 0], sizes = [8, 32], strides = [1, 1]} : vector<8x128xf32> to vector<8x32xf32>
    %179 = vector.extract_strided_slice %177 {offsets = [0, 32], sizes = [8, 32], strides = [1, 1]} : vector<8x128xf32> to vector<8x32xf32>
    %180 = vector.extract_strided_slice %177 {offsets = [0, 96], sizes = [8, 32], strides = [1, 1]} : vector<8x128xf32> to vector<8x32xf32>
    %181 = vector.extract_strided_slice %170 {offsets = [0, 64], sizes = [8, 32], strides = [1, 1]} : vector<8x128xf32> to vector<8x32xf32>
    %182 = math.tanh %181 : vector<8x32xf32>
    %183 = arith.mulf %179, %138 : vector<8x32xf32>
    %184 = arith.mulf %178, %182 : vector<8x32xf32>
    %185 = arith.addf %183, %184 : vector<8x32xf32>
    %186 = math.tanh %185 : vector<8x32xf32>
    %187 = arith.mulf %180, %186 : vector<8x32xf32>
    %188 = arith.truncf %187 : vector<8x32xf32> to vector<8x32xbf16>
    %cst_47 = arith.constant dense<0.000000e+00> : vector<8x128xf32>
    %189 = tpu.matmul %188, %20, %cst_47 {dimension_numbers = #tpu.dot_dimension_numbers<[1], [0], [0], [1], [0, 0, 1, 1], [], []>} : vector<8x32xbf16>, vector<32x128xbf16>, vector<8x128xf32> -> vector<8x128xf32>
    %190 = arith.truncf %166 : vector<8x32xf32> to vector<8x32xbf16>
    %cst_48 = arith.constant dense<0.000000e+00> : vector<8x128xf32>
    %191 = tpu.matmul %190, %21, %cst_48 {dimension_numbers = #tpu.dot_dimension_numbers<[1], [0], [0], [1], [0, 0, 1, 1], [], []>} : vector<8x32xbf16>, vector<32x128xbf16>, vector<8x128xf32> -> vector<8x128xf32>
    %192 = arith.addf %189, %191 : vector<8x128xf32>
    %193 = arith.addf %192, %24 : vector<8x128xf32>
    %cst_49 = arith.constant 5.000000e-01 : f32
    %194 = vector.broadcast %cst_49 : f32 to vector<8x128xf32>
    %195 = arith.mulf %194, %193 : vector<8x128xf32>
    %196 = math.tanh %195 : vector<8x128xf32>
    %cst_50 = arith.constant 5.000000e-01 : f32
    %197 = vector.broadcast %cst_50 : f32 to vector<8x128xf32>
    %198 = arith.mulf %197, %196 : vector<8x128xf32>
    %cst_51 = arith.constant 5.000000e-01 : f32
    %199 = vector.broadcast %cst_51 : f32 to vector<8x128xf32>
    %200 = arith.addf %198, %199 : vector<8x128xf32>
    %201 = vector.extract_strided_slice %200 {offsets = [0, 0], sizes = [8, 32], strides = [1, 1]} : vector<8x128xf32> to vector<8x32xf32>
    %202 = vector.extract_strided_slice %200 {offsets = [0, 32], sizes = [8, 32], strides = [1, 1]} : vector<8x128xf32> to vector<8x32xf32>
    %203 = vector.extract_strided_slice %200 {offsets = [0, 96], sizes = [8, 32], strides = [1, 1]} : vector<8x128xf32> to vector<8x32xf32>
    %204 = vector.extract_strided_slice %193 {offsets = [0, 64], sizes = [8, 32], strides = [1, 1]} : vector<8x128xf32> to vector<8x32xf32>
    %205 = math.tanh %204 : vector<8x32xf32>
    %206 = arith.mulf %202, %161 : vector<8x32xf32>
    %207 = arith.mulf %201, %205 : vector<8x32xf32>
    %208 = arith.addf %206, %207 : vector<8x32xf32>
    %209 = math.tanh %208 : vector<8x32xf32>
    %210 = arith.mulf %203, %209 : vector<8x32xf32>
    %211 = vector.extract_strided_slice %18 {offsets = [3, 0, 0], sizes = [1, 8, 32], strides = [1, 1, 1]} : vector<8x8x32xi1> to vector<1x8x32xi1>
    %212 = vector.shape_cast %211 : vector<1x8x32xi1> to vector<8x32xi1>
    %213 = arith.select %212, %210, %166 : vector<8x32xi1>, vector<8x32xf32>
    %214 = vector.extract_strided_slice %12 {offsets = [32, 0], sizes = [8, 128], strides = [1, 1]} : vector<64x128xf32> to vector<8x128xf32>
    %215 = arith.truncf %187 : vector<8x32xf32> to vector<8x32xbf16>
    %cst_52 = arith.constant dense<0.000000e+00> : vector<8x128xf32>
    %216 = tpu.matmul %215, %19, %cst_52 {dimension_numbers = #tpu.dot_dimension_numbers<[1], [0], [0], [1], [0, 0, 1, 1], [], []>} : vector<8x32xbf16>, vector<32x128xbf16>, vector<8x128xf32> -> vector<8x128xf32>
    %217 = arith.addf %214, %216 : vector<8x128xf32>
    %cst_53 = arith.constant 5.000000e-01 : f32
    %218 = vector.broadcast %cst_53 : f32 to vector<8x128xf32>
    %219 = arith.mulf %218, %217 : vector<8x128xf32>
    %220 = math.tanh %219 : vector<8x128xf32>
    %cst_54 = arith.constant 5.000000e-01 : f32
    %221 = vector.broadcast %cst_54 : f32 to vector<8x128xf32>
    %222 = arith.mulf %221, %220 : vector<8x128xf32>
    %cst_55 = arith.constant 5.000000e-01 : f32
    %223 = vector.broadcast %cst_55 : f32 to vector<8x128xf32>
    %224 = arith.addf %222, %223 : vector<8x128xf32>
    %225 = vector.extract_strided_slice %224 {offsets = [0, 0], sizes = [8, 32], strides = [1, 1]} : vector<8x128xf32> to vector<8x32xf32>
    %226 = vector.extract_strided_slice %224 {offsets = [0, 32], sizes = [8, 32], strides = [1, 1]} : vector<8x128xf32> to vector<8x32xf32>
    %227 = vector.extract_strided_slice %224 {offsets = [0, 96], sizes = [8, 32], strides = [1, 1]} : vector<8x128xf32> to vector<8x32xf32>
    %228 = vector.extract_strided_slice %217 {offsets = [0, 64], sizes = [8, 32], strides = [1, 1]} : vector<8x128xf32> to vector<8x32xf32>
    %229 = math.tanh %228 : vector<8x32xf32>
    %230 = arith.mulf %226, %185 : vector<8x32xf32>
    %231 = arith.mulf %225, %229 : vector<8x32xf32>
    %232 = arith.addf %230, %231 : vector<8x32xf32>
    %233 = math.tanh %232 : vector<8x32xf32>
    %234 = arith.mulf %227, %233 : vector<8x32xf32>
    %235 = arith.truncf %234 : vector<8x32xf32> to vector<8x32xbf16>
    %cst_56 = arith.constant dense<0.000000e+00> : vector<8x128xf32>
    %236 = tpu.matmul %235, %20, %cst_56 {dimension_numbers = #tpu.dot_dimension_numbers<[1], [0], [0], [1], [0, 0, 1, 1], [], []>} : vector<8x32xbf16>, vector<32x128xbf16>, vector<8x128xf32> -> vector<8x128xf32>
    %237 = arith.truncf %213 : vector<8x32xf32> to vector<8x32xbf16>
    %cst_57 = arith.constant dense<0.000000e+00> : vector<8x128xf32>
    %238 = tpu.matmul %237, %21, %cst_57 {dimension_numbers = #tpu.dot_dimension_numbers<[1], [0], [0], [1], [0, 0, 1, 1], [], []>} : vector<8x32xbf16>, vector<32x128xbf16>, vector<8x128xf32> -> vector<8x128xf32>
    %239 = arith.addf %236, %238 : vector<8x128xf32>
    %240 = arith.addf %239, %24 : vector<8x128xf32>
    %cst_58 = arith.constant 5.000000e-01 : f32
    %241 = vector.broadcast %cst_58 : f32 to vector<8x128xf32>
    %242 = arith.mulf %241, %240 : vector<8x128xf32>
    %243 = math.tanh %242 : vector<8x128xf32>
    %cst_59 = arith.constant 5.000000e-01 : f32
    %244 = vector.broadcast %cst_59 : f32 to vector<8x128xf32>
    %245 = arith.mulf %244, %243 : vector<8x128xf32>
    %cst_60 = arith.constant 5.000000e-01 : f32
    %246 = vector.broadcast %cst_60 : f32 to vector<8x128xf32>
    %247 = arith.addf %245, %246 : vector<8x128xf32>
    %248 = vector.extract_strided_slice %247 {offsets = [0, 0], sizes = [8, 32], strides = [1, 1]} : vector<8x128xf32> to vector<8x32xf32>
    %249 = vector.extract_strided_slice %247 {offsets = [0, 32], sizes = [8, 32], strides = [1, 1]} : vector<8x128xf32> to vector<8x32xf32>
    %250 = vector.extract_strided_slice %247 {offsets = [0, 96], sizes = [8, 32], strides = [1, 1]} : vector<8x128xf32> to vector<8x32xf32>
    %251 = vector.extract_strided_slice %240 {offsets = [0, 64], sizes = [8, 32], strides = [1, 1]} : vector<8x128xf32> to vector<8x32xf32>
    %252 = math.tanh %251 : vector<8x32xf32>
    %253 = arith.mulf %249, %208 : vector<8x32xf32>
    %254 = arith.mulf %248, %252 : vector<8x32xf32>
    %255 = arith.addf %253, %254 : vector<8x32xf32>
    %256 = math.tanh %255 : vector<8x32xf32>
    %257 = arith.mulf %250, %256 : vector<8x32xf32>
    %258 = vector.extract_strided_slice %18 {offsets = [4, 0, 0], sizes = [1, 8, 32], strides = [1, 1, 1]} : vector<8x8x32xi1> to vector<1x8x32xi1>
    %259 = vector.shape_cast %258 : vector<1x8x32xi1> to vector<8x32xi1>
    %260 = arith.select %259, %257, %213 : vector<8x32xi1>, vector<8x32xf32>
    %261 = vector.extract_strided_slice %12 {offsets = [40, 0], sizes = [8, 128], strides = [1, 1]} : vector<64x128xf32> to vector<8x128xf32>
    %262 = arith.truncf %234 : vector<8x32xf32> to vector<8x32xbf16>
    %cst_61 = arith.constant dense<0.000000e+00> : vector<8x128xf32>
    %263 = tpu.matmul %262, %19, %cst_61 {dimension_numbers = #tpu.dot_dimension_numbers<[1], [0], [0], [1], [0, 0, 1, 1], [], []>} : vector<8x32xbf16>, vector<32x128xbf16>, vector<8x128xf32> -> vector<8x128xf32>
    %264 = arith.addf %261, %263 : vector<8x128xf32>
    %cst_62 = arith.constant 5.000000e-01 : f32
    %265 = vector.broadcast %cst_62 : f32 to vector<8x128xf32>
    %266 = arith.mulf %265, %264 : vector<8x128xf32>
    %267 = math.tanh %266 : vector<8x128xf32>
    %cst_63 = arith.constant 5.000000e-01 : f32
    %268 = vector.broadcast %cst_63 : f32 to vector<8x128xf32>
    %269 = arith.mulf %268, %267 : vector<8x128xf32>
    %cst_64 = arith.constant 5.000000e-01 : f32
    %270 = vector.broadcast %cst_64 : f32 to vector<8x128xf32>
    %271 = arith.addf %269, %270 : vector<8x128xf32>
    %272 = vector.extract_strided_slice %271 {offsets = [0, 0], sizes = [8, 32], strides = [1, 1]} : vector<8x128xf32> to vector<8x32xf32>
    %273 = vector.extract_strided_slice %271 {offsets = [0, 32], sizes = [8, 32], strides = [1, 1]} : vector<8x128xf32> to vector<8x32xf32>
    %274 = vector.extract_strided_slice %271 {offsets = [0, 96], sizes = [8, 32], strides = [1, 1]} : vector<8x128xf32> to vector<8x32xf32>
    %275 = vector.extract_strided_slice %264 {offsets = [0, 64], sizes = [8, 32], strides = [1, 1]} : vector<8x128xf32> to vector<8x32xf32>
    %276 = math.tanh %275 : vector<8x32xf32>
    %277 = arith.mulf %273, %232 : vector<8x32xf32>
    %278 = arith.mulf %272, %276 : vector<8x32xf32>
    %279 = arith.addf %277, %278 : vector<8x32xf32>
    %280 = math.tanh %279 : vector<8x32xf32>
    %281 = arith.mulf %274, %280 : vector<8x32xf32>
    %282 = arith.truncf %281 : vector<8x32xf32> to vector<8x32xbf16>
    %cst_65 = arith.constant dense<0.000000e+00> : vector<8x128xf32>
    %283 = tpu.matmul %282, %20, %cst_65 {dimension_numbers = #tpu.dot_dimension_numbers<[1], [0], [0], [1], [0, 0, 1, 1], [], []>} : vector<8x32xbf16>, vector<32x128xbf16>, vector<8x128xf32> -> vector<8x128xf32>
    %284 = arith.truncf %260 : vector<8x32xf32> to vector<8x32xbf16>
    %cst_66 = arith.constant dense<0.000000e+00> : vector<8x128xf32>
    %285 = tpu.matmul %284, %21, %cst_66 {dimension_numbers = #tpu.dot_dimension_numbers<[1], [0], [0], [1], [0, 0, 1, 1], [], []>} : vector<8x32xbf16>, vector<32x128xbf16>, vector<8x128xf32> -> vector<8x128xf32>
    %286 = arith.addf %283, %285 : vector<8x128xf32>
    %287 = arith.addf %286, %24 : vector<8x128xf32>
    %cst_67 = arith.constant 5.000000e-01 : f32
    %288 = vector.broadcast %cst_67 : f32 to vector<8x128xf32>
    %289 = arith.mulf %288, %287 : vector<8x128xf32>
    %290 = math.tanh %289 : vector<8x128xf32>
    %cst_68 = arith.constant 5.000000e-01 : f32
    %291 = vector.broadcast %cst_68 : f32 to vector<8x128xf32>
    %292 = arith.mulf %291, %290 : vector<8x128xf32>
    %cst_69 = arith.constant 5.000000e-01 : f32
    %293 = vector.broadcast %cst_69 : f32 to vector<8x128xf32>
    %294 = arith.addf %292, %293 : vector<8x128xf32>
    %295 = vector.extract_strided_slice %294 {offsets = [0, 0], sizes = [8, 32], strides = [1, 1]} : vector<8x128xf32> to vector<8x32xf32>
    %296 = vector.extract_strided_slice %294 {offsets = [0, 32], sizes = [8, 32], strides = [1, 1]} : vector<8x128xf32> to vector<8x32xf32>
    %297 = vector.extract_strided_slice %294 {offsets = [0, 96], sizes = [8, 32], strides = [1, 1]} : vector<8x128xf32> to vector<8x32xf32>
    %298 = vector.extract_strided_slice %287 {offsets = [0, 64], sizes = [8, 32], strides = [1, 1]} : vector<8x128xf32> to vector<8x32xf32>
    %299 = math.tanh %298 : vector<8x32xf32>
    %300 = arith.mulf %296, %255 : vector<8x32xf32>
    %301 = arith.mulf %295, %299 : vector<8x32xf32>
    %302 = arith.addf %300, %301 : vector<8x32xf32>
    %303 = math.tanh %302 : vector<8x32xf32>
    %304 = arith.mulf %297, %303 : vector<8x32xf32>
    %305 = vector.extract_strided_slice %18 {offsets = [5, 0, 0], sizes = [1, 8, 32], strides = [1, 1, 1]} : vector<8x8x32xi1> to vector<1x8x32xi1>
    %306 = vector.shape_cast %305 : vector<1x8x32xi1> to vector<8x32xi1>
    %307 = arith.select %306, %304, %260 : vector<8x32xi1>, vector<8x32xf32>
    %308 = vector.extract_strided_slice %12 {offsets = [48, 0], sizes = [8, 128], strides = [1, 1]} : vector<64x128xf32> to vector<8x128xf32>
    %309 = arith.truncf %281 : vector<8x32xf32> to vector<8x32xbf16>
    %cst_70 = arith.constant dense<0.000000e+00> : vector<8x128xf32>
    %310 = tpu.matmul %309, %19, %cst_70 {dimension_numbers = #tpu.dot_dimension_numbers<[1], [0], [0], [1], [0, 0, 1, 1], [], []>} : vector<8x32xbf16>, vector<32x128xbf16>, vector<8x128xf32> -> vector<8x128xf32>
    %311 = arith.addf %308, %310 : vector<8x128xf32>
    %cst_71 = arith.constant 5.000000e-01 : f32
    %312 = vector.broadcast %cst_71 : f32 to vector<8x128xf32>
    %313 = arith.mulf %312, %311 : vector<8x128xf32>
    %314 = math.tanh %313 : vector<8x128xf32>
    %cst_72 = arith.constant 5.000000e-01 : f32
    %315 = vector.broadcast %cst_72 : f32 to vector<8x128xf32>
    %316 = arith.mulf %315, %314 : vector<8x128xf32>
    %cst_73 = arith.constant 5.000000e-01 : f32
    %317 = vector.broadcast %cst_73 : f32 to vector<8x128xf32>
    %318 = arith.addf %316, %317 : vector<8x128xf32>
    %319 = vector.extract_strided_slice %318 {offsets = [0, 0], sizes = [8, 32], strides = [1, 1]} : vector<8x128xf32> to vector<8x32xf32>
    %320 = vector.extract_strided_slice %318 {offsets = [0, 32], sizes = [8, 32], strides = [1, 1]} : vector<8x128xf32> to vector<8x32xf32>
    %321 = vector.extract_strided_slice %318 {offsets = [0, 96], sizes = [8, 32], strides = [1, 1]} : vector<8x128xf32> to vector<8x32xf32>
    %322 = vector.extract_strided_slice %311 {offsets = [0, 64], sizes = [8, 32], strides = [1, 1]} : vector<8x128xf32> to vector<8x32xf32>
    %323 = math.tanh %322 : vector<8x32xf32>
    %324 = arith.mulf %320, %279 : vector<8x32xf32>
    %325 = arith.mulf %319, %323 : vector<8x32xf32>
    %326 = arith.addf %324, %325 : vector<8x32xf32>
    %327 = math.tanh %326 : vector<8x32xf32>
    %328 = arith.mulf %321, %327 : vector<8x32xf32>
    %329 = arith.truncf %328 : vector<8x32xf32> to vector<8x32xbf16>
    %cst_74 = arith.constant dense<0.000000e+00> : vector<8x128xf32>
    %330 = tpu.matmul %329, %20, %cst_74 {dimension_numbers = #tpu.dot_dimension_numbers<[1], [0], [0], [1], [0, 0, 1, 1], [], []>} : vector<8x32xbf16>, vector<32x128xbf16>, vector<8x128xf32> -> vector<8x128xf32>
    %331 = arith.truncf %307 : vector<8x32xf32> to vector<8x32xbf16>
    %cst_75 = arith.constant dense<0.000000e+00> : vector<8x128xf32>
    %332 = tpu.matmul %331, %21, %cst_75 {dimension_numbers = #tpu.dot_dimension_numbers<[1], [0], [0], [1], [0, 0, 1, 1], [], []>} : vector<8x32xbf16>, vector<32x128xbf16>, vector<8x128xf32> -> vector<8x128xf32>
    %333 = arith.addf %330, %332 : vector<8x128xf32>
    %334 = arith.addf %333, %24 : vector<8x128xf32>
    %cst_76 = arith.constant 5.000000e-01 : f32
    %335 = vector.broadcast %cst_76 : f32 to vector<8x128xf32>
    %336 = arith.mulf %335, %334 : vector<8x128xf32>
    %337 = math.tanh %336 : vector<8x128xf32>
    %cst_77 = arith.constant 5.000000e-01 : f32
    %338 = vector.broadcast %cst_77 : f32 to vector<8x128xf32>
    %339 = arith.mulf %338, %337 : vector<8x128xf32>
    %cst_78 = arith.constant 5.000000e-01 : f32
    %340 = vector.broadcast %cst_78 : f32 to vector<8x128xf32>
    %341 = arith.addf %339, %340 : vector<8x128xf32>
    %342 = vector.extract_strided_slice %341 {offsets = [0, 0], sizes = [8, 32], strides = [1, 1]} : vector<8x128xf32> to vector<8x32xf32>
    %343 = vector.extract_strided_slice %341 {offsets = [0, 32], sizes = [8, 32], strides = [1, 1]} : vector<8x128xf32> to vector<8x32xf32>
    %344 = vector.extract_strided_slice %341 {offsets = [0, 96], sizes = [8, 32], strides = [1, 1]} : vector<8x128xf32> to vector<8x32xf32>
    %345 = vector.extract_strided_slice %334 {offsets = [0, 64], sizes = [8, 32], strides = [1, 1]} : vector<8x128xf32> to vector<8x32xf32>
    %346 = math.tanh %345 : vector<8x32xf32>
    %347 = arith.mulf %343, %302 : vector<8x32xf32>
    %348 = arith.mulf %342, %346 : vector<8x32xf32>
    %349 = arith.addf %347, %348 : vector<8x32xf32>
    %350 = math.tanh %349 : vector<8x32xf32>
    %351 = arith.mulf %344, %350 : vector<8x32xf32>
    %352 = vector.extract_strided_slice %18 {offsets = [6, 0, 0], sizes = [1, 8, 32], strides = [1, 1, 1]} : vector<8x8x32xi1> to vector<1x8x32xi1>
    %353 = vector.shape_cast %352 : vector<1x8x32xi1> to vector<8x32xi1>
    %354 = arith.select %353, %351, %307 : vector<8x32xi1>, vector<8x32xf32>
    %355 = vector.extract_strided_slice %12 {offsets = [56, 0], sizes = [8, 128], strides = [1, 1]} : vector<64x128xf32> to vector<8x128xf32>
    %356 = arith.truncf %328 : vector<8x32xf32> to vector<8x32xbf16>
    %cst_79 = arith.constant dense<0.000000e+00> : vector<8x128xf32>
    %357 = tpu.matmul %356, %19, %cst_79 {dimension_numbers = #tpu.dot_dimension_numbers<[1], [0], [0], [1], [0, 0, 1, 1], [], []>} : vector<8x32xbf16>, vector<32x128xbf16>, vector<8x128xf32> -> vector<8x128xf32>
    %358 = arith.addf %355, %357 : vector<8x128xf32>
    %cst_80 = arith.constant 5.000000e-01 : f32
    %359 = vector.broadcast %cst_80 : f32 to vector<8x128xf32>
    %360 = arith.mulf %359, %358 : vector<8x128xf32>
    %361 = math.tanh %360 : vector<8x128xf32>
    %cst_81 = arith.constant 5.000000e-01 : f32
    %362 = vector.broadcast %cst_81 : f32 to vector<8x128xf32>
    %363 = arith.mulf %362, %361 : vector<8x128xf32>
    %cst_82 = arith.constant 5.000000e-01 : f32
    %364 = vector.broadcast %cst_82 : f32 to vector<8x128xf32>
    %365 = arith.addf %363, %364 : vector<8x128xf32>
    %366 = vector.extract_strided_slice %365 {offsets = [0, 0], sizes = [8, 32], strides = [1, 1]} : vector<8x128xf32> to vector<8x32xf32>
    %367 = vector.extract_strided_slice %365 {offsets = [0, 32], sizes = [8, 32], strides = [1, 1]} : vector<8x128xf32> to vector<8x32xf32>
    %368 = vector.extract_strided_slice %365 {offsets = [0, 96], sizes = [8, 32], strides = [1, 1]} : vector<8x128xf32> to vector<8x32xf32>
    %369 = vector.extract_strided_slice %358 {offsets = [0, 64], sizes = [8, 32], strides = [1, 1]} : vector<8x128xf32> to vector<8x32xf32>
    %370 = math.tanh %369 : vector<8x32xf32>
    %371 = arith.mulf %367, %326 : vector<8x32xf32>
    %372 = arith.mulf %366, %370 : vector<8x32xf32>
    %373 = arith.addf %371, %372 : vector<8x32xf32>
    %374 = math.tanh %373 : vector<8x32xf32>
    %375 = arith.mulf %368, %374 : vector<8x32xf32>
    %376 = arith.truncf %375 : vector<8x32xf32> to vector<8x32xbf16>
    %cst_83 = arith.constant dense<0.000000e+00> : vector<8x128xf32>
    %377 = tpu.matmul %376, %20, %cst_83 {dimension_numbers = #tpu.dot_dimension_numbers<[1], [0], [0], [1], [0, 0, 1, 1], [], []>} : vector<8x32xbf16>, vector<32x128xbf16>, vector<8x128xf32> -> vector<8x128xf32>
    %378 = arith.truncf %354 : vector<8x32xf32> to vector<8x32xbf16>
    %cst_84 = arith.constant dense<0.000000e+00> : vector<8x128xf32>
    %379 = tpu.matmul %378, %21, %cst_84 {dimension_numbers = #tpu.dot_dimension_numbers<[1], [0], [0], [1], [0, 0, 1, 1], [], []>} : vector<8x32xbf16>, vector<32x128xbf16>, vector<8x128xf32> -> vector<8x128xf32>
    %380 = arith.addf %377, %379 : vector<8x128xf32>
    %381 = arith.addf %380, %24 : vector<8x128xf32>
    %cst_85 = arith.constant 5.000000e-01 : f32
    %382 = vector.broadcast %cst_85 : f32 to vector<8x128xf32>
    %383 = arith.mulf %382, %381 : vector<8x128xf32>
    %384 = math.tanh %383 : vector<8x128xf32>
    %cst_86 = arith.constant 5.000000e-01 : f32
    %385 = vector.broadcast %cst_86 : f32 to vector<8x128xf32>
    %386 = arith.mulf %385, %384 : vector<8x128xf32>
    %cst_87 = arith.constant 5.000000e-01 : f32
    %387 = vector.broadcast %cst_87 : f32 to vector<8x128xf32>
    %388 = arith.addf %386, %387 : vector<8x128xf32>
    %389 = vector.extract_strided_slice %388 {offsets = [0, 0], sizes = [8, 32], strides = [1, 1]} : vector<8x128xf32> to vector<8x32xf32>
    %390 = vector.extract_strided_slice %388 {offsets = [0, 32], sizes = [8, 32], strides = [1, 1]} : vector<8x128xf32> to vector<8x32xf32>
    %391 = vector.extract_strided_slice %388 {offsets = [0, 96], sizes = [8, 32], strides = [1, 1]} : vector<8x128xf32> to vector<8x32xf32>
    %392 = vector.extract_strided_slice %381 {offsets = [0, 64], sizes = [8, 32], strides = [1, 1]} : vector<8x128xf32> to vector<8x32xf32>
    %393 = math.tanh %392 : vector<8x32xf32>
    %394 = arith.mulf %390, %349 : vector<8x32xf32>
    %395 = arith.mulf %389, %393 : vector<8x32xf32>
    %396 = arith.addf %394, %395 : vector<8x32xf32>
    %397 = math.tanh %396 : vector<8x32xf32>
    %398 = arith.mulf %391, %397 : vector<8x32xf32>
    %399 = vector.extract_strided_slice %18 {offsets = [7, 0, 0], sizes = [1, 8, 32], strides = [1, 1, 1]} : vector<8x8x32xi1> to vector<1x8x32xi1>
    %400 = vector.shape_cast %399 : vector<1x8x32xi1> to vector<8x32xi1>
    %401 = arith.select %400, %398, %354 : vector<8x32xi1>, vector<8x32xf32>
    %c0_88 = arith.constant 0 : index
    %c0_89 = arith.constant 0 : index
    %402 = vector.load %arg8[%c0_88, %c0_89] : memref<32x128xf32, #tpu.memory_space<vmem>>, vector<32x128xf32>
    %cst_90 = arith.constant dense<0.000000e+00> : vector<8x128xf32>
    %403 = tpu.matmul %401, %402, %cst_90 {dimension_numbers = #tpu.dot_dimension_numbers<[1], [0], [0], [1], [0, 0, 1, 1], [], []>} : vector<8x32xf32>, vector<32x128xf32>, vector<8x128xf32> -> vector<8x128xf32>
    %c0_91 = arith.constant 0 : index
    %c0_92 = arith.constant 0 : index
    %404 = vector.load %arg9[%c0_91, %c0_92] : memref<1x128xf32, #tpu.memory_space<vmem>>, vector<1x128xf32>
    %405 = vector.broadcast %404 : vector<1x128xf32> to vector<8x128xf32>
    %406 = arith.addf %403, %405 : vector<8x128xf32>
    %c0_93 = arith.constant 0 : index
    %c0_94 = arith.constant 0 : index
    %407 = vector.load %arg10[%c0_93, %c0_94] : memref<8x128xf32, #tpu.memory_space<vmem>>, vector<8x128xf32>
    tpu.vector_store %arg10[%c0_93, %c0_94], %406 {strides = array<i32>} : memref<8x128xf32, #tpu.memory_space<vmem>>, vector<8x128xf32>,
    return
  }
}

</mosaic_0001>

<bundles_post_ra>
// kernel: adamnet_v2_forward.1
= control target key start
LH: loop header
LB: loop body
LE: loop exit
PB: predicated region body
PF: predicated region fallthrough
CT: control target
= control target key end

     0   :  { %15 = vsyncpa [#allocation3], 0  ;;  %s1830_s0 = inlined_call_operand.vmem [shape: s32[8,8], index: 0, kind: input, shape index: {}]   ;;  %s1831_s1 = inlined_call_operand.vmem [shape: s32[8,1], index: 1, kind: input, shape index: {}]   ;;  %s1832_s2 = inlined_call_operand.hbm [shape: f32[128,128], index: 2, kind: input, shape index: {}]   ;;  %s1833_s3 = inlined_call_operand.vmem [shape: f32[1,128], index: 3, kind: input, shape index: {}]   ;;  %s1834_s4 = inlined_call_operand.hbm [shape: bf16[32,128], index: 4, kind: input, shape index: {}]   ;;  %s1835_s5 = inlined_call_operand.hbm [shape: bf16[32,128], index: 5, kind: input, shape index: {}]   ;;  %s1836_s6 = inlined_call_operand.hbm [shape: bf16[32,128], index: 6, kind: input, shape index: {}]   ;;  %s1837_s7 = inlined_call_operand.vmem [shape: f32[1,128], index: 7, kind: input, shape index: {}]   ;;  %s1838_s8 = inlined_call_operand.vmem [shape: f32[32,128], index: 8, kind: input, shape index: {}]   ;;  %s1839_s9 = inlined_call_operand.vmem [shape: f32[1,128], index: 9, kind: input, shape index: {}]   ;;  %s1840_s10 = inlined_call_operand.vmem [shape: f32[8,128], index: 10, kind: output, shape index: {}]  }
   0x1   :  { %16 = vsyncpa [#allocation5], 0  ;;  %s41_s15 = sshll.u32 %s1834_s4, 4  ;;  %s42_s15 = int_to_ptr.hbm [resolvable:$true] %s41_s15 }
   0x2   :  { %17 = vsyncpa [#allocation8], 0  ;;  %s1432_s16 = smov [#allocation4]   ;;  %s26_s20 = sshll.u32 %s1832_s2, 4  ;;  %s27_s20 = int_to_ptr.hbm [resolvable:$true] %s26_s20 }
   0x3   :  { %s43_s17 = sshll.u32 %s1432_s16, 4  ;;  %s1433_s21 = smov 64   ;;  %s44_s17 = int_to_ptr.vmem [resolvable:$true] %s43_s17 }
   0x4   :  { %s1434_s22 = smov 4   ;;  %s1435_s23 = smov [#allocation2]  }
   0x5   :  { %49 = dma.hbm_to_vmem [thread:$0]  %s42_s15, 256, %s44_s17, [#allocation5], %s1433_s21, %s1433_s21, %s1434_s22  }
   0x6   :  { %s28_s24 = sshll.u32 %s1435_s23, 4  ;;  %s1436_s25 = smov 128   ;;  %s29_s24 = int_to_ptr.vmem [resolvable:$true] %s28_s24 }
   0x7   :  { %s1437_s4 = smov 8   ;;  %s54_s28 = sshll.u32 %s1835_s5, 4  ;;  %s55_s28 = int_to_ptr.hbm [resolvable:$true] %s54_s28 }
   0x8   :  { %34 = dma.hbm_to_vmem [thread:$0]  %s27_s20, 2048, %s29_s24, [#allocation3], %s1436_s25, %s1436_s25, %s1437_s4  }
   0x9   :  { %s1438_s29 = smov [#allocation6]   ;;  %s67_s12 = sshll.u32 %s1836_s6, 4  ;;  %s68_s12 = int_to_ptr.hbm [resolvable:$true] %s67_s12 }
   0xa   :  { %s56_s30 = sshll.u32 %s1438_s29, 4  ;;  %s1439_s13 = smov [#allocation7]   ;;  %s57_s30 = int_to_ptr.vmem [resolvable:$true] %s56_s30 }
   0xb   :  { %62 = dma.hbm_to_vmem [thread:$0]  %s55_s28, 256, %s57_s30, [#allocation5], %s1433_s21, %s1433_s21, %s1434_s22  }
   0xc   :  { %s69_s14 = sshll.u32 %s1439_s13, 4  ;;  %s70_s14 = int_to_ptr.vmem [resolvable:$true] %s69_s14 }
   0xd   :  { %75 = dma.hbm_to_vmem [thread:$0]  %s68_s12, 256, %s70_s14, [#allocation8], %s1433_s21, %s1433_s21, %s1434_s22  }
   0xe   :  { %1426 = dma.done.wait [#allocation3], 2048  }
   0xf   :  { %1427 = vsyncadd [#allocation3], 4294965248 }
  0x10   :  { %1428 = dma.done.wait [#allocation5], 512  }
  0x11   :  { %1429 = vsyncadd [#allocation5], 4294966784 }
  0x12   :  { %1430 = dma.done.wait [#allocation8], 256  }
  0x13   :  { %1431 = vsyncadd [#allocation8], 4294967040  ;;  %v101_v0 = vlaneseq  ;;  %v1524_v2 = vld [vmem:[%s1830_s0] sm:$0xff]  ;;  %v197_v3 = vld [vmem:[#allocation2 + $0x78] sm:$0xff]  ;;  %v1440_v14 = vmov 0   ;;  %v1441_v25 = vmov 1.0  }
  0x14   :  { %v196_v4 = vld [vmem:[#allocation2 + $0x70] sm:$0xff]  ;;  %v100_v5 = vperm.slane %v1524_v2, 0  ;;  %202 = vmatpush.msra.mxu0 %v197_v3  ;;  %v195_v6 = vld [vmem:[#allocation2 + $0x68] sm:$0xff]  ;;  %v194_v8 = vld [vmem:[#allocation2 + $0x60] sm:$0xff]  ;;  %s1442_s16 = smov 32   ;;  %v107_v50 = vperm.slane %v1524_v2, 1 }
  0x15   :  { %v1516_v1 = vshrl.u32 %v101_v0, 7  ;;  %v1527_v7 = vld [vmem:[#allocation4 + $0x8] sm:$0xff]  ;;  %v193_v9 = vld [vmem:[#allocation2 + $0x58] sm:$0xff]  ;;  %v1529_v10 = vld [vmem:[#allocation4] sm:$0xff]  ;;  %v1540_v23 = vand.u32 127, %v101_v0  ;;  %vm283_vm1 = vcmask 261120  }
  0x16   :  { %203 = vmatpush.msra.mxu0 %v196_v4  ;;  %293 = vmatpush.bf16.msra.mxu1 %v1527_v7  ;;  %v192_v11 = vld [vmem:[#allocation2 + $0x50] sm:$0xff]  ;;  %v191_v12 = vld [vmem:[#allocation2 + $0x48] sm:$0xff]  ;;  %v190_v13 = vld [vmem:[#allocation2 + $0x40] sm:$0xff] }
  0x17   :  { %1225 = vset.pattern.permute.xlu0 %v1516_v1  ;;  %1226 = vset.pattern.permute.xlu2 %v1516_v1  ;;  %v189_v15 = vld [vmem:[#allocation2 + $0x38] sm:$0xff]  ;;  %v188_v16 = vld [vmem:[#allocation2 + $0x30] sm:$0xff]  ;;  %v187_v17 = vld [vmem:[#allocation2 + $0x28] sm:$0xff] }
  0x18   :  { %1228 = vset.pattern.permute.xlu1 %v1516_v1  ;;  %204 = vmatpush.msra.mxu0 %v195_v6  ;;  %v186_v18 = vld [vmem:[#allocation2 + $0x20] sm:$0xff]  ;;  %v185_v19 = vld [vmem:[#allocation2 + $0x18] sm:$0xff]  ;;  %v184_v20 = vld [vmem:[#allocation2 + $0x10] sm:$0xff] }
  0x19   :  { %v183_v21 = vld [vmem:[#allocation2 + $0x8] sm:$0xff]  ;;  %v182_v22 = vld [vmem:[#allocation2] sm:$0xff]  ;;  %v1558_v44 = vld [vmem:[#allocation6 + $0x8] sm:$0xff] }
  0x1a   :  { %205 = vmatpush.msra.mxu0 %v194_v8  ;;  %294 = vmatpush.bf16.msra.mxu1 %v1529_v10  ;;  %v1547_v28 = vld [vmem:[%s1833_s3] ss:$0 sm:$0xff]  ;;  %v1556_v43 = vld [vmem:[#allocation7 + $0x8] sm:$0xff]  ;;  %v1564_v46 = vld [vmem:[#allocation6] sm:$0xff] }
  0x1b   :  { %342 = vmatpush.bf16.msra.mxu2 %v1556_v43  ;;  %v1561_v45 = vld [vmem:[#allocation7] sm:$0xff]  ;;  %373 = vmatpush.bf16.msra.mxu3 %v1558_v44 }
  0x1c   :  { %206 = vmatpush.msra.mxu0 %v193_v9  ;;  %v1591_v56 = vld [vmem:[%s1837_s7] ss:$0 sm:$0xff] }
  0x1d   :  { %295 = vmatmul.bf16.vlgmr.msra.gmra.mxu1 %v1440_v14 }
  0x1e   :  { %207 = vmatpush.msra.mxu0 %v192_v11  ;;  %410 = vmatpush.bf16.msrb.mxu1 %v1527_v7 }
  0x1f   :  { %105 = vperm.xlu0 %1225, %v100_v5   ;;  %343 = vmatpush.bf16.msra.mxu2 %v1561_v45 }
  0x20   :  { %208 = vmatpush.msra.mxu0 %v191_v12  ;;  %374 = vmatpush.bf16.msra.mxu3 %v1564_v46 }
  0x22   :  { %209 = vmatpush.msra.mxu0 %v190_v13  ;;  %411 = vmatpush.bf16.msrb.mxu1 %v1529_v10 }
  0x23   :  { %454 = vmatpush.bf16.msrb.mxu2 %v1556_v43 }
  0x24   :  { %210 = vmatpush.msra.mxu0 %v189_v15  ;;  %473 = vmatpush.bf16.msrb.mxu3 %v1558_v44 }
  0x25   :  { %344 = vmatmul.bf16.vlgmr.msra.gmra.mxu2 %v1440_v14 }
  0x26   :  { %510 = vmatpush.bf16.msra.mxu1 %v1527_v7  ;;  %211 = vmatpush.msra.mxu0 %v188_v16 }
  0x27   :  { %455 = vmatpush.bf16.msrb.mxu2 %v1561_v45 }
  0x28   :  { %212 = vmatpush.msra.mxu0 %v187_v17  ;;  %474 = vmatpush.bf16.msrb.mxu3 %v1564_v46 }
  0x2a   :  { %511 = vmatpush.bf16.msra.mxu1 %v1529_v10  ;;  %213 = vmatpush.msra.mxu0 %v186_v18 }
  0x2b   :  { %554 = vmatpush.bf16.msra.mxu2 %v1556_v43 }
  0x2c   :  { %214 = vmatpush.msra.mxu0 %v185_v19 }
  0x2e   :  { %215 = vmatpush.msra.mxu0 %v184_v20  ;;  %v243_v20 = vld [vmem:[%s1831_s1] sm:$0xff] }
  0x2f   :  { %555 = vmatpush.bf16.msra.mxu2 %v1561_v45 }
  0x30   :  { %216 = vmatpush.msra.mxu0 %v183_v21 }
  0x32   :  { %217 = vmatpush.msra.mxu0 %v182_v22 }
  0x34   :  { %910 = vmatpush.bf16.msrb.mxu0 %v1527_v7 }
  0x38   :  { %911 = vmatpush.bf16.msrb.mxu0 %v1529_v10 }
  0x91   :  { %v106_v24 = vpop.permute.xlu0 %105 }
  0x92   :  { %vm158_vm0 = vcmp.eq.s32.totalorder %v106_v24, %v1540_v23 }
  0x93   :  { %1153 = vmatmul.msk.f32.vlgmr.msra.gmra.mxu0 %vm158_vm0, %v1441_v25 }
  0x94   :  { %1054 = vmatpush.bf16.msra.mxu0 %v1556_v43 }
  0x98   :  { %1055 = vmatpush.bf16.msra.mxu0 %v1561_v45 }
  0x9a   :  { %v296_v26 = vpop.f32.mrf.mxu1 }
  0xa2   :  { %v298_v27 = vpop.f32.mrf.mxu1 }
  0xa8   :  { %v345_v53 = vpop.f32.mrf.mxu2 }
  0xb0   :  { %v347_v54 = vpop.f32.mrf.mxu2 }
 0x110   :  { %v219_v29 = vpop.f32.mrf.mxu0 }
 0x111   :  { %v220_v30 = vadd.f32 %v1547_v28, %v219_v29 }
 0x113   :  { %v300_v31 = vadd.f32 %v296_v26, %v220_v30 }
 0x115   :  { %1234 = vtanh.f32 %v300_v31  ;;  %v301_v33 = vmul.f32 0.5, %v300_v31 }
 0x117   :  { %1236 = vtanh.f32 %v301_v33 }
 0x11b   :  { %v1235_v32 = vpop.eup %1234 }
 0x11c   :  { %308 = vrot.lane.b32.xlu0 %v1235_v32, %s1433_s21  ;;  %v114_v32 = vperm.slane %v1524_v2, 2 }
 0x11d   :  { %v1237_v34 = vpop.eup %1236 }
 0x11e   :  { %v303_v35 = vmul.f32 0.5, %v1237_v34 }
 0x120   :  { %v304_v36 = vadd.f32 0.5, %v303_v35 }
 0x122   :  { %v306_v39 = vmul.f32 0.0, %v304_v36 }
 0x18e   :  { %v309_v37 = vpop.permute.xlu0 %308 }
 0x18f   :  { %v311_v38 = vmul.f32 %v309_v37, %v304_v36 }
 0x191   :  { %313 = vrot.lane.b32.xlu1 %v311_v38, %s1442_s16 }
 0x203   :  { %v314_v40 = vpop.permute.xlu1 %313 }
 0x204   :  { %v1552_v41 = vadd.f32 %v314_v40, %v306_v39 }
 0x206   :  { %1238 = vtanh.f32 %v1552_v41 }
 0x20c   :  { %v1239_v42 = vpop.eup %1238 }
 0x20d   :  { %319 = vrot.lane.b32.xlu1 %v1239_v42, %s1433_s21 }
 0x27f   :  { %v320_v47 = vpop.permute.xlu1 %319 }
 0x280   :  { %v322_v48 = vmul.f32 %v320_v47, %v304_v36 }
 0x282   :  { %v323_v49 = vpack.c.bf16 %v322_v48, %v322_v48 }
 0x284   :  { %350 = vrot.lane.b32.xlu2 %v323_v49, %s1442_s16 }
 0x28c   :  { %112 = vperm.xlu2 %1226, %v107_v50  }
 0x294   :  { %1227 = vset.pattern.permute.xlu2 %v1440_v14 }
 0x2de   :  { %v351_v51 = vpop.permute.xlu2 %350 }
 0x2df   :  { %1185 = vmatmul.msk.bf16.vlgmr.msra.gmra.mxu3 %vm283_vm1, %v351_v51  ;;  %1186 = vmatmul.msk.bf16.vlgmr.msrb.gmra.mxu1 %vm283_vm1, %v351_v51 }
 0x2e0   :  { %573 = vmatpush.bf16.msra.mxu3 %v1558_v44  ;;  %610 = vmatpush.bf16.msrb.mxu1 %v1527_v7 }
 0x2e4   :  { %574 = vmatpush.bf16.msra.mxu3 %v1564_v46  ;;  %611 = vmatpush.bf16.msrb.mxu1 %v1529_v10 }
 0x2e6   :  { %v113_v52 = vpop.permute.xlu2 %112 }
 0x2e7   :  { %vm159_vm2 = vcmp.eq.s32.totalorder %v113_v52, %v1540_v23 }
 0x2e8   :  { %1154 = vmatmul.msk.f32.gmra.mxu0 %vm159_vm2, %v1441_v25 }
 0x35c   :  { %v413_v55 = vpop.f32.mrf.mxu1 }
 0x362   :  { %v376_v57 = vpop.f32.mrf.mxu3 }
 0x363   :  { %v377_v58 = vadd.f32 %v376_v57, %v345_v53 }
 0x364   :  { %v415_v59 = vpop.f32.mrf.mxu1 }
 0x365   :  { %v380_v60 = vadd.f32 %v1591_v56, %v377_v58  ;;  %v222_v61 = vpop.f32.mrf.mxu0 }
 0x366   :  { %v223_v62 = vadd.f32 %v1547_v28, %v222_v61 }
 0x367   :  { %1240 = vtanh.f32 %v380_v60  ;;  %v381_v5 = vmul.f32 0.5, %v380_v60 }
 0x368   :  { %v417_v63 = vadd.f32 %v413_v55, %v223_v62 }
 0x36a   :  { %1242 = vtanh.f32 %v417_v63  ;;  %v378_v0 = vpop.f32.mrf.mxu3  ;;  %v418_v6 = vmul.f32 0.5, %v417_v63 }
 0x36b   :  { %1244 = vtanh.f32 %v381_v5 }
 0x36c   :  { %1246 = vtanh.f32 %v418_v6 }
 0x36d   :  { %v1241_v3 = vpop.eup %1240 }
 0x36e   :  { %388 = vrot.lane.b32.xlu0 %v1241_v3, %s1433_s21 }
 0x370   :  { %v1243_v4 = vpop.eup %1242 }
 0x371   :  { %425 = vrot.lane.b32.xlu1 %v1243_v4, %s1433_s21  ;;  %v1245_v8 = vpop.eup %1244 }
 0x372   :  { %v1247_v9 = vpop.eup %1246  ;;  %v383_v11 = vmul.f32 0.5, %v1245_v8 }
 0x373   :  { %v420_v12 = vmul.f32 0.5, %v1247_v9 }
 0x374   :  { %v384_v13 = vadd.f32 0.5, %v383_v11 }
 0x375   :  { %v421_v17 = vadd.f32 0.5, %v420_v12 }
 0x376   :  { %v386_v21 = vmul.f32 0.0, %v384_v13 }
 0x377   :  { %v423_v27 = vmul.f32 %v421_v17, %v1552_v41 }
 0x3e0   :  { %v389_v15 = vpop.permute.xlu0 %388 }
 0x3e1   :  { %v391_v16 = vmul.f32 %v389_v15, %v384_v13 }
 0x3e3   :  { %393 = vrot.lane.b32.xlu2 %v391_v16, %s1442_s16  ;;  %v426_v18 = vpop.permute.xlu1 %425 }
 0x3e4   :  { %v428_v19 = vmul.f32 %v426_v18, %v421_v17  ;;  %v121_v18 = vperm.slane %v1524_v2, 3 }
 0x3e6   :  { %430 = vrot.lane.b32.xlu0 %v428_v19, %s1442_s16 }
 0x3eb   :  { %245 = vperm.xlu2 %1227, %v243_v20  }
 0x3f3   :  { %1229 = vset.pattern.permute.xlu2 %v1516_v1 }
 0x43d   :  { %v394_v22 = vpop.permute.xlu2 %393 }
 0x43e   :  { %v1602_v24 = vadd.f32 %v394_v22, %v386_v21 }
 0x440   :  { %1248 = vtanh.f32 %v1602_v24 }
 0x445   :  { %v1613_v33 = vpop.permute.xlu2 %245 }
 0x446   :  { %v1249_v26 = vpop.eup %1248  ;;  %vm247_vm3 = vcmp.gt.s32.totalorder %v1613_v33, 0  ;;  %vm248_vm6 = vcmp.gt.s32.totalorder %v1613_v33, 1  ;;  %vm249_vm8 = vcmp.gt.s32.totalorder %v1613_v33, 2  ;;  %vm250_vm10 = vcmp.gt.s32.totalorder %v1613_v33, 3 }
 0x447   :  { %399 = vrot.lane.b32.xlu1 %v1249_v26, %s1433_s21  ;;  %vm251_vm12 = vcmp.gt.s32.totalorder %v1613_v33, 4  ;;  %vm252_vm14 = vcmp.gt.s32.totalorder %v1613_v33, 5  ;;  %vm253_vm15 = vcmp.gt.s32.totalorder %v1613_v33, 6  ;;  %vm254_vm0 = vcmp.gt.s32.totalorder %v1613_v33, 7 }
 0x458   :  { %v431_v29 = vpop.permute.xlu0 %430 }
 0x459   :  { %v1608_v30 = vadd.f32 %v431_v29, %v423_v27 }
 0x45b   :  { %1250 = vtanh.f32 %v1608_v30 }
 0x461   :  { %v1251_v31 = vpop.eup %1250 }
 0x462   :  { %436 = vrot.lane.b32.xlu0 %v1251_v31, %s1433_s21 }
 0x46a   :  { %119 = vperm.xlu0 %1225, %v114_v32  }
 0x4b9   :  { %v400_v34 = vpop.permute.xlu1 %399 }
 0x4ba   :  { %v402_v1 = vmul.f32 %v400_v34, %v384_v13 }
 0x4bc   :  { %v1616_v35 = vsel %vm247_vm3, %v402_v1, 0.0 }
 0x4bd   :  { %v441_v36 = vpack.c.bf16 %v1616_v35, %v1616_v35 }
 0x4bf   :  { %443 = vrot.lane.b32.xlu1 %v441_v36, %s1442_s16 }
 0x4d4   :  { %v437_v37 = vpop.permute.xlu0 %436 }
 0x4d5   :  { %v439_v38 = vmul.f32 %v437_v37, %v421_v17 }
 0x4d7   :  { %v440_v39 = vpack.c.bf16 %v439_v38, %v439_v38 }
 0x4d9   :  { %462 = vrot.lane.b32.xlu2 %v440_v39, %s1442_s16 }
 0x4dc   :  { %v120_v40 = vpop.permute.xlu0 %119 }
 0x4dd   :  { %vm160_vm4 = vcmp.eq.s32.totalorder %v120_v40, %v1540_v23 }
 0x4de   :  { %1155 = vmatmul.msk.f32.gmra.mxu0 %vm160_vm4, %v1441_v25 }
 0x531   :  { %v444_v41 = vpop.permute.xlu1 %443 }
 0x532   :  { %1187 = vmatmul.msk.bf16.vlgmr.msrb.gmra.mxu2 %vm283_vm1, %v444_v41 }
 0x533   :  { %v463_v42 = vpop.permute.xlu2 %462  ;;  %654 = vmatpush.bf16.msrb.mxu2 %v1556_v43 }
 0x534   :  { %1188 = vmatmul.msk.bf16.vlgmr.msrb.gmra.mxu3 %vm283_vm1, %v463_v42  ;;  %1189 = vmatmul.msk.bf16.vlgmr.msra.gmra.mxu1 %vm283_vm1, %v463_v42 }
 0x535   :  { %673 = vmatpush.bf16.msrb.mxu3 %v1558_v44  ;;  %710 = vmatpush.bf16.msra.mxu1 %v1527_v7 }
 0x537   :  { %655 = vmatpush.bf16.msrb.mxu2 %v1561_v45 }
 0x539   :  { %674 = vmatpush.bf16.msrb.mxu3 %v1564_v46  ;;  %711 = vmatpush.bf16.msra.mxu1 %v1529_v10 }
 0x55b   :  { %v225_v47 = vpop.f32.mrf.mxu0 }
 0x55c   :  { %v226_v48 = vadd.f32 %v1547_v28, %v225_v47 }
 0x5b1   :  { %v513_v49 = vpop.f32.mrf.mxu1 }
 0x5b2   :  { %v517_v50 = vadd.f32 %v513_v49, %v226_v48 }
 0x5b4   :  { %1252 = vtanh.f32 %v517_v50  ;;  %v518_v61 = vmul.f32 0.5, %v517_v50 }
 0x5b5   :  { %v457_v51 = vpop.f32.mrf.mxu2 }
 0x5b7   :  { %v476_v52 = vpop.f32.mrf.mxu3 }
 0x5b8   :  { %v477_v53 = vadd.f32 %v476_v52, %v457_v51 }
 0x5b9   :  { %v515_v54 = vpop.f32.mrf.mxu1 }
 0x5ba   :  { %v1253_v55 = vpop.eup %1252  ;;  %v480_v57 = vadd.f32 %v1591_v56, %v477_v53 }
 0x5bb   :  { %525 = vrot.lane.b32.xlu2 %v1253_v55, %s1433_s21 }
 0x5bc   :  { %1254 = vtanh.f32 %v480_v57  ;;  %v481_v5 = vmul.f32 0.5, %v480_v57 }
 0x5bd   :  { %v459_v58 = vpop.f32.mrf.mxu2  ;;  %1256 = vtanh.f32 %v518_v61 }
 0x5be   :  { %1258 = vtanh.f32 %v481_v5 }
 0x5bf   :  { %v478_v59 = vpop.f32.mrf.mxu3 }
 0x5c2   :  { %v1255_v60 = vpop.eup %1254 }
 0x5c3   :  { %488 = vrot.lane.b32.xlu1 %v1255_v60, %s1433_s21  ;;  %v1257_v62 = vpop.eup %1256 }
 0x5c4   :  { %v520_v63 = vmul.f32 0.5, %v1257_v62  ;;  %v1259_v6 = vpop.eup %1258 }
 0x5c5   :  { %v483_v8 = vmul.f32 0.5, %v1259_v6 }
 0x5c6   :  { %v521_v0 = vadd.f32 0.5, %v520_v63 }
 0x5c7   :  { %v484_v9 = vadd.f32 0.5, %v483_v8 }
 0x5c8   :  { %v523_v13 = vmul.f32 %v521_v0, %v1608_v30 }
 0x5c9   :  { %v486_v19 = vmul.f32 %v484_v9, %v1602_v24 }
 0x615   :  { %v526_v3 = vpop.permute.xlu2 %525 }
 0x616   :  { %v528_v4 = vmul.f32 %v526_v3, %v521_v0 }
 0x618   :  { %530 = vrot.lane.b32.xlu1 %v528_v4, %s1442_s16 }
 0x635   :  { %v489_v11 = vpop.permute.xlu1 %488 }
 0x636   :  { %v491_v12 = vmul.f32 %v489_v11, %v484_v9 }
 0x638   :  { %493 = vrot.lane.b32.xlu0 %v491_v12, %s1442_s16 }
 0x68a   :  { %v531_v15 = vpop.permute.xlu1 %530 }
 0x68b   :  { %v1640_v16 = vadd.f32 %v531_v15, %v523_v13 }
 0x68d   :  { %1260 = vtanh.f32 %v1640_v16 }
 0x693   :  { %v1261_v17 = vpop.eup %1260 }
 0x694   :  { %536 = vrot.lane.b32.xlu0 %v1261_v17, %s1433_s21 }
 0x69c   :  { %126 = vperm.xlu0 %1225, %v121_v18  }
 0x6aa   :  { %v494_v20 = vpop.permute.xlu0 %493 }
 0x6ab   :  { %v1646_v21 = vadd.f32 %v494_v20, %v486_v19 }
 0x6ad   :  { %1262 = vtanh.f32 %v1646_v21 }
 0x6b3   :  { %v1263_v22 = vpop.eup %1262 }
 0x6b4   :  { %499 = vrot.lane.b32.xlu2 %v1263_v22, %s1433_s21 }
 0x706   :  { %v537_v26 = vpop.permute.xlu0 %536 }
 0x707   :  { %v539_v27 = vmul.f32 %v537_v26, %v521_v0 }
 0x709   :  { %v540_v29 = vpack.c.bf16 %v539_v27, %v539_v27 }
 0x70b   :  { %562 = vrot.lane.b32.xlu2 %v540_v29, %s1442_s16 }
 0x70e   :  { %v127_v30 = vpop.permute.xlu0 %126  ;;  %v500_v31 = vpop.permute.xlu2 %499 }
 0x70f   :  { %vm161_vm5 = vcmp.eq.s32.totalorder %v127_v30, %v1540_v23  ;;  %v502_v32 = vmul.f32 %v500_v31, %v484_v9  ;;  %v128_v9 = vperm.slane %v1524_v2, 4 }
 0x710   :  { %1156 = vmatmul.msk.f32.gmra.mxu0 %vm161_vm5, %v1441_v25 }
 0x711   :  { %v1655_v24 = vsel %vm248_vm6, %v502_v32, %v1616_v35 }
 0x712   :  { %v541_v34 = vpack.c.bf16 %v1655_v24, %v1655_v24 }
 0x714   :  { %543 = vrot.lane.b32.xlu1 %v541_v34, %s1442_s16 }
 0x765   :  { %v563_v1 = vpop.permute.xlu2 %562 }
 0x766   :  { %1191 = vmatmul.msk.bf16.vlgmr.msra.gmra.mxu3 %vm283_vm1, %v563_v1  ;;  %1192 = vmatmul.msk.bf16.vlgmr.msrb.gmra.mxu1 %vm283_vm1, %v563_v1 }
 0x767   :  { %773 = vmatpush.bf16.msra.mxu3 %v1558_v44  ;;  %810 = vmatpush.bf16.msrb.mxu1 %v1527_v7 }
 0x76b   :  { %774 = vmatpush.bf16.msra.mxu3 %v1564_v46  ;;  %811 = vmatpush.bf16.msrb.mxu1 %v1529_v10 }
 0x786   :  { %v544_v35 = vpop.permute.xlu1 %543 }
 0x787   :  { %1190 = vmatmul.msk.bf16.vlgmr.msra.gmra.mxu2 %vm283_vm1, %v544_v35 }
 0x788   :  { %754 = vmatpush.bf16.msra.mxu2 %v1556_v43 }
 0x78c   :  { %755 = vmatpush.bf16.msra.mxu2 %v1561_v45 }
 0x78d   :  { %v228_v36 = vpop.f32.mrf.mxu0 }
 0x78e   :  { %v229_v37 = vadd.f32 %v1547_v28, %v228_v36 }
 0x7e3   :  { %v613_v38 = vpop.f32.mrf.mxu1 }
 0x7e4   :  { %v617_v39 = vadd.f32 %v613_v38, %v229_v37 }
 0x7e6   :  { %1264 = vtanh.f32 %v617_v39  ;;  %v618_v53 = vmul.f32 0.5, %v617_v39 }
 0x7e9   :  { %v576_v40 = vpop.f32.mrf.mxu3 }
 0x7eb   :  { %v615_v41 = vpop.f32.mrf.mxu1 }
 0x7ec   :  { %v1265_v42 = vpop.eup %1264 }
 0x7ed   :  { %625 = vrot.lane.b32.xlu2 %v1265_v42, %s1433_s21 }
 0x7f1   :  { %v578_v47 = vpop.f32.mrf.mxu3 }
 0x80a   :  { %v557_v48 = vpop.f32.mrf.mxu2 }
 0x80b   :  { %v577_v49 = vadd.f32 %v576_v40, %v557_v48 }
 0x80d   :  { %v580_v50 = vadd.f32 %v1591_v56, %v577_v49 }
 0x80f   :  { %1266 = vtanh.f32 %v580_v50  ;;  %v581_v60 = vmul.f32 0.5, %v580_v50 }
 0x810   :  { %1268 = vtanh.f32 %v618_v53 }
 0x811   :  { %1270 = vtanh.f32 %v581_v60 }
 0x812   :  { %v559_v51 = vpop.f32.mrf.mxu2 }
 0x815   :  { %v1267_v52 = vpop.eup %1266 }
 0x816   :  { %588 = vrot.lane.b32.xlu1 %v1267_v52, %s1433_s21  ;;  %v1269_v54 = vpop.eup %1268 }
 0x817   :  { %v620_v55 = vmul.f32 0.5, %v1269_v54  ;;  %v1271_v61 = vpop.eup %1270 }
 0x818   :  { %v583_v62 = vmul.f32 0.5, %v1271_v61  ;;  %v135_v61 = vperm.slane %v1524_v2, 5 }
 0x819   :  { %v621_v57 = vadd.f32 0.5, %v620_v55 }
 0x81a   :  { %v584_v63 = vadd.f32 0.5, %v583_v62 }
 0x81b   :  { %v623_v4 = vmul.f32 %v621_v57, %v1640_v16 }
 0x81c   :  { %v586_v11 = vmul.f32 %v584_v63, %v1646_v21 }
 0x847   :  { %v626_v58 = vpop.permute.xlu2 %625 }
 0x848   :  { %v628_v59 = vmul.f32 %v626_v58, %v621_v57 }
 0x84a   :  { %630 = vrot.lane.b32.xlu1 %v628_v59, %s1442_s16 }
 0x888   :  { %v589_v0 = vpop.permute.xlu1 %588 }
 0x889   :  { %v591_v3 = vmul.f32 %v589_v0, %v584_v63 }
 0x88b   :  { %593 = vrot.lane.b32.xlu0 %v591_v3, %s1442_s16 }
 0x8bc   :  { %v631_v5 = vpop.permute.xlu1 %630 }
 0x8bd   :  { %v1676_v6 = vadd.f32 %v631_v5, %v623_v4 }
 0x8bf   :  { %1272 = vtanh.f32 %v1676_v6 }
 0x8c5   :  { %v1273_v8 = vpop.eup %1272 }
 0x8c6   :  { %636 = vrot.lane.b32.xlu0 %v1273_v8, %s1433_s21 }
 0x8ce   :  { %133 = vperm.xlu0 %1225, %v128_v9  }
 0x8fd   :  { %v594_v12 = vpop.permute.xlu0 %593 }
 0x8fe   :  { %v1682_v13 = vadd.f32 %v594_v12, %v586_v11 }
 0x900   :  { %1274 = vtanh.f32 %v1682_v13 }
 0x906   :  { %v1275_v15 = vpop.eup %1274 }
 0x907   :  { %599 = vrot.lane.b32.xlu2 %v1275_v15, %s1433_s21 }
 0x938   :  { %v637_v16 = vpop.permute.xlu0 %636 }
 0x939   :  { %v639_v17 = vmul.f32 %v637_v16, %v621_v57 }
 0x93b   :  { %v640_v18 = vpack.c.bf16 %v639_v17, %v639_v17 }
 0x93d   :  { %662 = vrot.lane.b32.xlu2 %v640_v18, %s1442_s16 }
 0x940   :  { %v134_v19 = vpop.permute.xlu0 %133 }
 0x941   :  { %vm162_vm7 = vcmp.eq.s32.totalorder %v134_v19, %v1540_v23 }
 0x942   :  { %1157 = vmatmul.msk.f32.gmra.mxu0 %vm162_vm7, %v1441_v25 }
 0x961   :  { %v600_v20 = vpop.permute.xlu2 %599 }
 0x962   :  { %v602_v21 = vmul.f32 %v600_v20, %v584_v63 }
 0x964   :  { %v1691_v22 = vsel %vm249_vm8, %v602_v21, %v1655_v24 }
 0x965   :  { %v641_v26 = vpack.c.bf16 %v1691_v22, %v1691_v22 }
 0x967   :  { %643 = vrot.lane.b32.xlu1 %v641_v26, %s1442_s16 }
 0x997   :  { %v663_v27 = vpop.permute.xlu2 %662 }
 0x998   :  { %1194 = vmatmul.msk.bf16.vlgmr.msrb.gmra.mxu3 %vm283_vm1, %v663_v27  ;;  %1195 = vmatmul.msk.bf16.vlgmr.msra.gmra.mxu1 %vm283_vm1, %v663_v27 }
 0x999   :  { %873 = vmatpush.bf16.msrb.mxu3 %v1558_v44  ;;  %954 = vmatpush.bf16.msra.mxu1 %v1556_v43 }
 0x99d   :  { %874 = vmatpush.bf16.msrb.mxu3 %v1564_v46  ;;  %955 = vmatpush.bf16.msra.mxu1 %v1561_v45 }
 0x9bf   :  { %v231_v30 = vpop.f32.mrf.mxu0 }
 0x9c0   :  { %v232_v31 = vadd.f32 %v1547_v28, %v231_v30 }
 0x9d9   :  { %v644_v29 = vpop.permute.xlu1 %643 }
 0x9da   :  { %1193 = vmatmul.msk.bf16.vlgmr.msrb.gmra.mxu2 %vm283_vm1, %v644_v29 }
 0x9db   :  { %854 = vmatpush.bf16.msrb.mxu2 %v1556_v43 }
 0x9df   :  { %855 = vmatpush.bf16.msrb.mxu2 %v1561_v45 }
 0xa15   :  { %v713_v32 = vpop.f32.mrf.mxu1 }
 0xa16   :  { %v717_v24 = vadd.f32 %v713_v32, %v232_v31 }
 0xa18   :  { %1276 = vtanh.f32 %v717_v24  ;;  %v718_v40 = vmul.f32 0.5, %v717_v24 }
 0xa1b   :  { %v676_v34 = vpop.f32.mrf.mxu3 }
 0xa1d   :  { %v715_v1 = vpop.f32.mrf.mxu1 }
 0xa1e   :  { %v1277_v35 = vpop.eup %1276 }
 0xa1f   :  { %725 = vrot.lane.b32.xlu2 %v1277_v35, %s1433_s21 }
 0xa23   :  { %v678_v36 = vpop.f32.mrf.mxu3 }
 0xa5d   :  { %v657_v37 = vpop.f32.mrf.mxu2 }
 0xa5e   :  { %v677_v38 = vadd.f32 %v676_v34, %v657_v37 }
 0xa60   :  { %v680_v39 = vadd.f32 %v1591_v56, %v677_v38 }
 0xa62   :  { %1278 = vtanh.f32 %v680_v39  ;;  %v681_v50 = vmul.f32 0.5, %v680_v39 }
 0xa63   :  { %1280 = vtanh.f32 %v718_v40 }
 0xa64   :  { %1282 = vtanh.f32 %v681_v50 }
 0xa65   :  { %v659_v43 = vpop.f32.mrf.mxu2 }
 0xa68   :  { %v1279_v45 = vpop.eup %1278 }
 0xa69   :  { %688 = vrot.lane.b32.xlu1 %v1279_v45, %s1433_s21  ;;  %v1281_v41 = vpop.eup %1280 }
 0xa6a   :  { %v720_v42 = vmul.f32 0.5, %v1281_v41  ;;  %v1283_v51 = vpop.eup %1282 }
 0xa6b   :  { %v683_v52 = vmul.f32 0.5, %v1283_v51  ;;  %v149_v51 = vperm.slane %v1524_v2, 7 }
 0xa6c   :  { %v721_v47 = vadd.f32 0.5, %v720_v42  ;;  %v142_v42 = vperm.slane %v1524_v2, 6 }
 0xa6d   :  { %v684_v53 = vadd.f32 0.5, %v683_v52 }
 0xa6e   :  { %v723_v57 = vmul.f32 %v721_v47, %v1676_v6 }
 0xa6f   :  { %v686_v62 = vmul.f32 %v684_v53, %v1682_v13 }
 0xa79   :  { %v726_v48 = vpop.permute.xlu2 %725 }
 0xa7a   :  { %v728_v49 = vmul.f32 %v726_v48, %v721_v47 }
 0xa7c   :  { %730 = vrot.lane.b32.xlu1 %v728_v49, %s1442_s16 }
 0xadb   :  { %v689_v54 = vpop.permute.xlu1 %688 }
 0xadc   :  { %v691_v55 = vmul.f32 %v689_v54, %v684_v53 }
 0xade   :  { %693 = vrot.lane.b32.xlu0 %v691_v55, %s1442_s16 }
 0xaee   :  { %v731_v58 = vpop.permute.xlu1 %730 }
 0xaef   :  { %v1712_v59 = vadd.f32 %v731_v58, %v723_v57 }
 0xaf1   :  { %1284 = vtanh.f32 %v1712_v59 }
 0xaf7   :  { %v1285_v60 = vpop.eup %1284 }
 0xaf8   :  { %736 = vrot.lane.b32.xlu0 %v1285_v60, %s1433_s21 }
 0xb00   :  { %140 = vperm.xlu0 %1225, %v135_v61  }
 0xb08   :  { %1230 = vset.pattern.permute.xlu0 %v1440_v14 }
 0xb50   :  { %v694_v63 = vpop.permute.xlu0 %693 }
 0xb51   :  { %v1719_v0 = vadd.f32 %v694_v63, %v686_v62 }
 0xb53   :  { %1286 = vtanh.f32 %v1719_v0 }
 0xb59   :  { %v1287_v3 = vpop.eup %1286 }
 0xb5a   :  { %699 = vrot.lane.b32.xlu2 %v1287_v3, %s1433_s21 }
 0xb6a   :  { %v737_v4 = vpop.permute.xlu0 %736 }
 0xb6b   :  { %v739_v5 = vmul.f32 %v737_v4, %v721_v47 }
 0xb6d   :  { %v740_v6 = vpack.c.bf16 %v739_v5, %v739_v5 }
 0xb6f   :  { %762 = vrot.lane.b32.xlu2 %v740_v6, %s1442_s16 }
 0xb72   :  { %v141_v8 = vpop.permute.xlu0 %140 }
 0xb73   :  { %vm163_vm9 = vcmp.eq.s32.totalorder %v141_v8, %v1540_v23 }
 0xb74   :  { %1158 = vmatmul.msk.f32.gmra.mxu0 %vm163_vm9, %v1441_v25 }
 0xbb4   :  { %v700_v14 = vpop.permute.xlu2 %699 }
 0xbb5   :  { %v702_v9 = vmul.f32 %v700_v14, %v684_v53 }
 0xbb7   :  { %v1728_v11 = vsel %vm250_vm10, %v702_v9, %v1691_v22 }
 0xbb8   :  { %v741_v12 = vpack.c.bf16 %v1728_v11, %v1728_v11 }
 0xbba   :  { %743 = vrot.lane.b32.xlu1 %v741_v12, %s1442_s16 }
 0xbc9   :  { %v763_v13 = vpop.permute.xlu2 %762 }
 0xbca   :  { %1197 = vmatmul.msk.bf16.vlgmr.msra.gmra.mxu3 %vm283_vm1, %v763_v13  ;;  %1198 = vmatmul.msk.bf16.vlgmr.msrb.gmra.mxu1 %vm283_vm1, %v763_v13 }
 0xbcb   :  { %1010 = vmatpush.bf16.msra.mxu3 %v1527_v7  ;;  %1073 = vmatpush.bf16.msrb.mxu1 %v1558_v44 }
 0xbcf   :  { %1011 = vmatpush.bf16.msra.mxu3 %v1529_v10  ;;  %1074 = vmatpush.bf16.msrb.mxu1 %v1564_v46 }
 0xbf1   :  { %v234_v16 = vpop.f32.mrf.mxu0 }
 0xbf2   :  { %v235_v17 = vadd.f32 %v1547_v28, %v234_v16 }
 0xc2c   :  { %v744_v15 = vpop.permute.xlu1 %743 }
 0xc2d   :  { %1196 = vmatmul.msk.bf16.vlgmr.msra.gmra.mxu2 %vm283_vm1, %v744_v15 }
 0xc2e   :  { %973 = vmatpush.bf16.msra.mxu2 %v1558_v44 }
 0xc32   :  { %974 = vmatpush.bf16.msra.mxu2 %v1564_v46 }
 0xc47   :  { %v813_v18 = vpop.f32.mrf.mxu1 }
 0xc48   :  { %v817_v19 = vadd.f32 %v813_v18, %v235_v17 }
 0xc4a   :  { %1288 = vtanh.f32 %v817_v19  ;;  %v818_v22 = vmul.f32 0.5, %v817_v19 }
 0xc4c   :  { %1290 = vtanh.f32 %v818_v22 }
 0xc4d   :  { %v776_v7 = vpop.f32.mrf.mxu3 }
 0xc4f   :  { %v815_v20 = vpop.f32.mrf.mxu1 }
 0xc50   :  { %v1289_v21 = vpop.eup %1288 }
 0xc51   :  { %825 = vrot.lane.b32.xlu2 %v1289_v21, %s1433_s21 }
 0xc52   :  { %v1291_v29 = vpop.eup %1290 }
 0xc53   :  { %v820_v31 = vmul.f32 0.5, %v1291_v29 }
 0xc55   :  { %v778_v10 = vpop.f32.mrf.mxu3  ;;  %v821_v24 = vadd.f32 0.5, %v820_v31 }
 0xc57   :  { %v823_v43 = vmul.f32 %v821_v24, %v1712_v59 }
 0xcab   :  { %v826_v32 = vpop.permute.xlu2 %825 }
 0xcac   :  { %v828_v34 = vmul.f32 %v826_v32, %v821_v24 }
 0xcb0   :  { %v757_v26 = vpop.f32.mrf.mxu2 }
 0xcb1   :  { %v777_v27 = vadd.f32 %v776_v7, %v757_v26 }
 0xcb3   :  { %v780_v44 = vadd.f32 %v1591_v56, %v777_v27 }
 0xcb5   :  { %1292 = vtanh.f32 %v780_v44  ;;  %v781_v1 = vmul.f32 0.5, %v780_v44 }
 0xcb7   :  { %1294 = vtanh.f32 %v781_v1 }
 0xcb8   :  { %v759_v46 = vpop.f32.mrf.mxu2 }
 0xcbb   :  { %v1293_v30 = vpop.eup %1292 }
 0xcbc   :  { %788 = vrot.lane.b32.xlu1 %v1293_v30, %s1433_s21 }
 0xcbd   :  { %v1295_v35 = vpop.eup %1294 }
 0xcbe   :  { %v783_v36 = vmul.f32 0.5, %v1295_v35 }
 0xcc0   :  { %v784_v37 = vadd.f32 0.5, %v783_v36 }
 0xcc2   :  { %v786_v47 = vmul.f32 %v784_v37, %v1719_v0 }
 0xcc4   :  { %830 = vrot.lane.b32.xlu1 %v828_v34, %s1442_s16 }
 0xccc   :  { %147 = vperm.xlu1 %1228, %v142_v42  }
 0xd2e   :  { %v789_v38 = vpop.permute.xlu1 %788 }
 0xd2f   :  { %v791_v39 = vmul.f32 %v789_v38, %v784_v37 }
 0xd31   :  { %793 = vrot.lane.b32.xlu0 %v791_v39, %s1442_s16 }
 0xd36   :  { %v831_v40 = vpop.permute.xlu1 %830 }
 0xd37   :  { %v1749_v45 = vadd.f32 %v831_v40, %v823_v43 }
 0xd39   :  { %1296 = vtanh.f32 %v1749_v45 }
 0xd3e   :  { %v148_v55 = vpop.permute.xlu1 %147 }
 0xd3f   :  { %v1297_v41 = vpop.eup %1296  ;;  %vm164_vm11 = vcmp.eq.s32.totalorder %v148_v55, %v1540_v23 }
 0xd40   :  { %836 = vrot.lane.b32.xlu0 %v1297_v41, %s1433_s21  ;;  %1159 = vmatmul.msk.f32.gmra.mxu0 %vm164_vm11, %v1441_v25 }
 0xda3   :  { %v794_v48 = vpop.permute.xlu0 %793 }
 0xda4   :  { %v1755_v49 = vadd.f32 %v794_v48, %v786_v47 }
 0xda6   :  { %1298 = vtanh.f32 %v1755_v49 }
 0xdac   :  { %v1299_v50 = vpop.eup %1298 }
 0xdad   :  { %799 = vrot.lane.b32.xlu2 %v1299_v50, %s1433_s21 }
 0xdb2   :  { %v837_v52 = vpop.permute.xlu0 %836 }
 0xdb3   :  { %v839_v53 = vmul.f32 %v837_v52, %v821_v24 }
 0xdb5   :  { %v840_v54 = vpack.c.bf16 %v839_v53, %v839_v53  ;;  %154 = vperm.xlu2 %1229, %v149_v51  }
 0xdb7   :  { %862 = vrot.lane.b32.xlu1 %v840_v54, %s1442_s16 }
 0xdbd   :  { %v237_v63 = vpop.f32.mrf.mxu0 }
 0xdbe   :  { %v238_v3 = vadd.f32 %v1547_v28, %v237_v63 }
 0xe07   :  { %v800_v57 = vpop.permute.xlu2 %799 }
 0xe08   :  { %v802_v58 = vmul.f32 %v800_v57, %v784_v37 }
 0xe0a   :  { %v1765_v59 = vsel %vm251_vm12, %v802_v58, %v1728_v11 }
 0xe0b   :  { %v841_v2 = vpack.c.bf16 %v1765_v59, %v1765_v59 }
 0xe0d   :  { %843 = vrot.lane.b32.xlu0 %v841_v2, %s1442_s16 }
 0xe0f   :  { %v155_v60 = vpop.permute.xlu2 %154 }
 0xe10   :  { %vm165_vm13 = vcmp.eq.s32.totalorder %v155_v60, %v1540_v23 }
 0xe11   :  { %1160 = vmatmul.msk.f32.gmra.mxu0 %vm165_vm13, %v1441_v25 }
 0xe29   :  { %v863_v61 = vpop.permute.xlu1 %862 }
 0xe2a   :  { %1200 = vmatmul.msk.bf16.vlgmr.msrb.gmra.mxu3 %vm283_vm1, %v863_v61  ;;  %1201 = vmatmul.msk.bf16.vlgmr.msrb.gmra.mxu0 %vm283_vm1, %v863_v61 }
 0xe7f   :  { %v844_v62 = vpop.permute.xlu0 %843 }
 0xe80   :  { %1199 = vmatmul.msk.bf16.vlgmr.msrb.gmra.mxu2 %vm283_vm1, %v844_v62 }
 0xe8e   :  { %v240_v0 = vpop.f32.mrf.mxu0 }
 0xe8f   :  { %v241_v41 = vadd.f32 %v1547_v28, %v240_v0 }
 0xea7   :  { %v913_v4 = vpop.f32.mrf.mxu0 }
 0xea8   :  { %v917_v5 = vadd.f32 %v913_v4, %v238_v3 }
 0xeaa   :  { %1300 = vtanh.f32 %v917_v5  ;;  %v918_v14 = vmul.f32 0.5, %v917_v5 }
 0xeac   :  { %1302 = vtanh.f32 %v918_v14 }
 0xead   :  { %v876_v6 = vpop.f32.mrf.mxu3 }
 0xeaf   :  { %v915_v8 = vpop.f32.mrf.mxu0 }
 0xeb0   :  { %v1301_v23 = vpop.eup %1300 }
 0xeb1   :  { %925 = vrot.lane.b32.xlu2 %v1301_v23, %s1433_s21 }
 0xeb2   :  { %v1303_v9 = vpop.eup %1302 }
 0xeb3   :  { %v920_v13 = vmul.f32 0.5, %v1303_v9 }
 0xeb5   :  { %v878_v25 = vpop.f32.mrf.mxu3  ;;  %v921_v16 = vadd.f32 0.5, %v920_v13 }
 0xeb7   :  { %v923_v22 = vmul.f32 %v921_v16, %v1749_v45 }
 0xf03   :  { %v857_v11 = vpop.f32.mrf.mxu2 }
 0xf04   :  { %v877_v12 = vadd.f32 %v876_v6, %v857_v11 }
 0xf06   :  { %v880_v15 = vadd.f32 %v1591_v56, %v877_v12 }
 0xf08   :  { %1304 = vtanh.f32 %v880_v15  ;;  %v881_v20 = vmul.f32 0.5, %v880_v15 }
 0xf0a   :  { %1306 = vtanh.f32 %v881_v20 }
 0xf0b   :  { %v859_v17 = vpop.f32.mrf.mxu2  ;;  %v926_v18 = vpop.permute.xlu2 %925 }
 0xf0c   :  { %v928_v19 = vmul.f32 %v926_v18, %v921_v16 }
 0xf0e   :  { %v1305_v7 = vpop.eup %1304  ;;  %930 = vrot.lane.b32.xlu1 %v928_v19, %s1442_s16 }
 0xf0f   :  { %888 = vrot.lane.b32.xlu0 %v1305_v7, %s1433_s21 }
 0xf10   :  { %v1307_v21 = vpop.eup %1306 }
 0xf11   :  { %v883_v10 = vmul.f32 0.5, %v1307_v21 }
 0xf13   :  { %v884_v27 = vadd.f32 0.5, %v883_v10 }
 0xf15   :  { %v886_v31 = vmul.f32 %v884_v27, %v1755_v49 }
 0xf80   :  { %v931_v26 = vpop.permute.xlu1 %930 }
 0xf81   :  { %v933_v44 = vadd.f32 %v931_v26, %v923_v22  ;;  %v889_v46 = vpop.permute.xlu0 %888 }
 0xf82   :  { %v891_v29 = vmul.f32 %v889_v46, %v884_v27 }
 0xf83   :  { %1308 = vtanh.f32 %v933_v44 }
 0xf84   :  { %893 = vrot.lane.b32.xlu2 %v891_v29, %s1442_s16 }
 0xf89   :  { %v1309_v30 = vpop.eup %1308 }
 0xf8a   :  { %936 = vrot.lane.b32.xlu0 %v1309_v30, %s1433_s21 }
 0xfde   :  { %v894_v32 = vpop.permute.xlu2 %893 }
 0xfdf   :  { %v896_v24 = vadd.f32 %v894_v32, %v886_v31 }
 0xfe1   :  { %1310 = vtanh.f32 %v896_v24 }
 0xfe7   :  { %v1311_v34 = vpop.eup %1310 }
 0xfe8   :  { %899 = vrot.lane.b32.xlu1 %v1311_v34, %s1433_s21 }
 0xffc   :  { %v937_v1 = vpop.permute.xlu0 %936 }
 0xffd   :  { %v939_v35 = vmul.f32 %v937_v1, %v921_v16 }
 0xfff   :  { %v940_v36 = vpack.c.bf16 %v939_v35, %v939_v35 }
0x1001   :  { %962 = vrot.lane.b32.xlu2 %v940_v36, %s1442_s16 }
0x105a   :  { %v900_v37 = vpop.permute.xlu1 %899 }
0x105b   :  { %v902_v38 = vmul.f32 %v900_v37, %v884_v27  ;;  %v963_v39 = vpop.permute.xlu2 %962 }
0x105c   :  { %1203 = vmatmul.msk.bf16.vlgmr.msra.gmra.mxu2 %vm283_vm1, %v963_v39  ;;  %1204 = vmatmul.msk.bf16.vlgmr.msra.gmra.mxu3 %vm283_vm1, %v963_v39  ;;  %v1106_v39 = vld [vmem:[%s1838_s8 + $0x10] sm:$0xff] }
0x105d   :  { %v903_v43 = vsel %vm252_vm14, %v902_v38, %v1765_v59 }
0x105e   :  { %v941_v40 = vpack.c.bf16 %v903_v43, %v903_v43 }
0x1060   :  { %943 = vrot.lane.b32.xlu0 %v941_v40, %s1442_s16  ;;  %v1104_v40 = vld [vmem:[%s1838_s8] sm:$0xff] }
0x10d2   :  { %v944_v45 = vpop.permute.xlu0 %943 }
0x10d3   :  { %1202 = vmatmul.msk.bf16.vlgmr.msra.gmra.mxu1 %vm283_vm1, %v944_v45 }
0x10df   :  { %v976_v42 = vpop.f32.mrf.mxu2  ;;  %v1013_v47 = vpop.f32.mrf.mxu3 }
0x10e0   :  { %v1017_v48 = vadd.f32 %v1013_v47, %v241_v41 }
0x10e2   :  { %1312 = vtanh.f32 %v1017_v48  ;;  %v1018_v52 = vmul.f32 0.5, %v1017_v48  ;;  %v1233_v48 = vld [vmem:[%s1839_s9] ss:$0 sm:$0xff] }
0x10e4   :  { %1314 = vtanh.f32 %v1018_v52 }
0x10e7   :  { %v978_v49 = vpop.f32.mrf.mxu2  ;;  %v1015_v50 = vpop.f32.mrf.mxu3 }
0x10e8   :  { %v1313_v51 = vpop.eup %1312 }
0x10e9   :  { %1025 = vrot.lane.b32.xlu2 %v1313_v51, %s1433_s21 }
0x10ea   :  { %v1315_v58 = vpop.eup %1314 }
0x10eb   :  { %v1020_v28 = vmul.f32 0.5, %v1315_v58 }
0x10ed   :  { %v1021_v60 = vadd.f32 0.5, %v1020_v28 }
0x10ef   :  { %v1023_v6 = vmul.f32 %v1021_v60, %v933_v44 }
0x1143   :  { %v1026_v2 = vpop.permute.xlu2 %1025 }
0x1144   :  { %v1028_v61 = vmul.f32 %v1026_v2, %v1021_v60 }
0x1150   :  { %v957_v53 = vpop.f32.mrf.mxu1 }
0x1151   :  { %v977_v54 = vadd.f32 %v976_v42, %v957_v53 }
0x1153   :  { %v980_v55 = vadd.f32 %v1591_v56, %v977_v54 }
0x1155   :  { %1316 = vtanh.f32 %v980_v55  ;;  %v981_v62 = vmul.f32 0.5, %v980_v55 }
0x1157   :  { %1318 = vtanh.f32 %v981_v62 }
0x1158   :  { %v959_v57 = vpop.f32.mrf.mxu1 }
0x115b   :  { %v1317_v59 = vpop.eup %1316 }
0x115c   :  { %988 = vrot.lane.b32.xlu1 %v1317_v59, %s1433_s21 }
0x115d   :  { %v1319_v63 = vpop.eup %1318 }
0x115e   :  { %v983_v0 = vmul.f32 0.5, %v1319_v63 }
0x1160   :  { %v984_v3 = vadd.f32 0.5, %v983_v0 }
0x1162   :  { %v986_v14 = vmul.f32 %v984_v3, %v896_v24 }
0x1164   :  { %1030 = vrot.lane.b32.xlu1 %v1028_v61, %s1442_s16 }
0x11ce   :  { %v989_v4 = vpop.permute.xlu1 %988 }
0x11cf   :  { %v991_v5 = vmul.f32 %v989_v4, %v984_v3 }
0x11d1   :  { %993 = vrot.lane.b32.xlu0 %v991_v5, %s1442_s16 }
0x11d6   :  { %v1031_v8 = vpop.permute.xlu1 %1030 }
0x11d7   :  { %v1033_v23 = vadd.f32 %v1031_v8, %v1023_v6 }
0x11d9   :  { %1320 = vtanh.f32 %v1033_v23 }
0x11df   :  { %v1321_v25 = vpop.eup %1320 }
0x11e0   :  { %1036 = vrot.lane.b32.xlu0 %v1321_v25, %s1433_s21 }
0x1243   :  { %v994_v9 = vpop.permute.xlu0 %993 }
0x1244   :  { %v996_v11 = vadd.f32 %v994_v9, %v986_v14 }
0x1246   :  { %1322 = vtanh.f32 %v996_v11 }
0x124c   :  { %v1323_v12 = vpop.eup %1322 }
0x124d   :  { %999 = vrot.lane.b32.xlu2 %v1323_v12, %s1433_s21 }
0x1252   :  { %v1037_v13 = vpop.permute.xlu0 %1036 }
0x1253   :  { %v1039_v15 = vmul.f32 %v1037_v13, %v1021_v60 }
0x1255   :  { %v1040_v16 = vpack.c.bf16 %v1039_v15, %v1039_v15 }
0x1257   :  { %1062 = vrot.lane.b32.xlu2 %v1040_v16, %s1442_s16 }
0x12a7   :  { %v1000_v17 = vpop.permute.xlu2 %999 }
0x12a8   :  { %v1002_v18 = vmul.f32 %v1000_v17, %v984_v3 }
0x12aa   :  { %v1003_v19 = vsel %vm253_vm15, %v1002_v18, %v903_v43  ;;  %v1105_v43 = vld [vmem:[%s1838_s8 + $0x8] sm:$0xff] }
0x12ab   :  { %v1041_v7 = vpack.c.bf16 %v1003_v19, %v1003_v19 }
0x12ad   :  { %1043 = vrot.lane.b32.xlu1 %v1041_v7, %s1442_s16 }
0x12b1   :  { %v1063_v20 = vpop.permute.xlu2 %1062 }
0x12b2   :  { %1206 = vmatmul.msk.bf16.vlgmr.msrb.gmra.mxu1 %vm283_vm1, %v1063_v20 }
0x131f   :  { %v1044_v21 = vpop.permute.xlu1 %1043 }
0x1320   :  { %1205 = vmatmul.msk.bf16.vlgmr.msra.gmra.mxu0 %vm283_vm1, %v1044_v21 }
0x132f   :  { %v1076_v10 = vpop.f32.mrf.mxu1 }
0x1337   :  { %v1078_v22 = vpop.f32.mrf.mxu1 }
0x139d   :  { %v1057_v26 = vpop.f32.mrf.mxu0 }
0x139e   :  { %v1077_v27 = vadd.f32 %v1076_v10, %v1057_v26 }
0x13a0   :  { %v1080_v44 = vadd.f32 %v1591_v56, %v1077_v27  ;;  %v1107_v56 = vld [vmem:[%s1838_s8 + $0x18] sm:$0xff] }
0x13a1   :  { %1129 = vmatpush.msrb.mxu2 %v1107_v56 }
0x13a2   :  { %1324 = vtanh.f32 %v1080_v44  ;;  %v1081_v30 = vmul.f32 0.5, %v1080_v44 }
0x13a3   :  { %1130 = vmatpush.msrb.mxu2 %v1106_v39 }
0x13a4   :  { %1326 = vtanh.f32 %v1081_v30 }
0x13a5   :  { %v1059_v46 = vpop.f32.mrf.mxu0  ;;  %1131 = vmatpush.msrb.mxu2 %v1105_v43 }
0x13a7   :  { %1132 = vmatpush.msrb.mxu2 %v1104_v40 }
0x13a8   :  { %v1325_v29 = vpop.eup %1324 }
0x13a9   :  { %1088 = vrot.lane.b32.xlu0 %v1325_v29, %s1433_s21 }
0x13aa   :  { %v1327_v31 = vpop.eup %1326 }
0x13ab   :  { %v1083_v32 = vmul.f32 0.5, %v1327_v31 }
0x13ad   :  { %v1084_v24 = vadd.f32 0.5, %v1083_v32 }
0x13af   :  { %v1086_v35 = vmul.f32 %v1084_v24, %v996_v11 }
0x141b   :  { %v1089_v34 = vpop.permute.xlu0 %1088 }
0x141c   :  { %v1091_v1 = vmul.f32 %v1089_v34, %v1084_v24 }
0x141e   :  { %1093 = vrot.lane.b32.xlu1 %v1091_v1, %s1442_s16 }
0x1490   :  { %v1094_v36 = vpop.permute.xlu1 %1093 }
0x1491   :  { %v1096_v37 = vadd.f32 %v1094_v36, %v1086_v35 }
0x1493   :  { %1328 = vtanh.f32 %v1096_v37 }
0x1499   :  { %v1329_v38 = vpop.eup %1328 }
0x149a   :  { %1099 = vrot.lane.b32.xlu2 %v1329_v38, %s1433_s21 }
0x14f4   :  { %v1100_v45 = vpop.permute.xlu2 %1099 }
0x14f5   :  { %v1102_v41 = vmul.f32 %v1100_v45, %v1084_v24 }
0x14f7   :  { %v1103_v42 = vsel %vm254_vm0, %v1102_v41, %v1003_v19 }
0x14f8   :  { %1113 = vrot.lane.b32.xlu0 %v1103_v42, %s1442_s16 }
0x156a   :  { %v1114_v47 = vpop.permute.xlu0 %1113 }
0x156b   :  { %1207 = vmatmul.msk.f32.vlgmr.msrb.gmra.mxu2 %vm283_vm1, %v1114_v47 }
0x15ee   :  { %v1134_v49 = vpop.f32.mrf.mxu2 }
0x15ef   :  { %v1135_v50 = vadd.f32 %v1233_v48, %v1134_v49 }
0x15f1   :  { %1137 = vst [vmem:[%s1840_s10] sm:$0xff] %v1135_v50 }
0x15f2   :  { %1142 = vsyncpa [#allocation3], 1 }
0x15f3   :  { %1143 = vsyncpa [#allocation5], 1 }
0x15f4   :  { %1144 = vsyncpa [#allocation8], 1 }

</bundles_post_ra>
